<compile_context>
chip_gen: v7x
topology: tpu7x:2x2x1
jax: 0.10.0
libtpu: 0.0.40
codegen_flags: <defaults>
</compile_context>

<pallas_src>
import functools
import math

import jax
import jax.numpy as jnp
from jax import lax
from jax.experimental import pallas as pl
from jax.experimental.pallas import tpu as pltpu


# ---------------------------------------------------------------------------
# Helpers
# ---------------------------------------------------------------------------
def _pick_tile(n, cap, mult):
    """Largest divisor of n that is <= cap, preferring multiples of `mult`
    (sublane / lane alignment). Falls back to any divisor, then to n."""
    cap = max(1, min(cap, n))
    start = cap - cap % mult
    for t in range(start, 0, -mult):
        if n % t == 0:
            return t
    for t in range(cap, 0, -1):
        if n % t == 0:
            return t
    return n


def _vmem_limit_bytes():
    """Generation-aware scoped-VMEM cap: ~96 MiB on v5e/v6e (128 MiB physical),
    ~48 MiB on v7x (64 MiB physical). Conservative fallback if query fails."""
    try:
        cap = int(pltpu.get_tpu_info().vmem_capacity_bytes)
    except Exception:
        cap = 64 * 1024 * 1024
    return cap * 3 // 4


def _default_bf16_exp():
    """bf16 EUP exp only exists on v6e / v7x; keep f32 exp on v4 / v5e."""
    try:
        kind = jax.devices()[0].device_kind.lower()
    except Exception:
        return False
    return ("v6" in kind) or ("v7" in kind) or ("7x" in kind)


def _maybe_buffered_spec(shape, index_map, buffer_count):
    """BlockSpec with reduced buffering when supported (frees VMEM for blocks
    whose index changes rarely); falls back to a plain spec otherwise."""
    try:
        return pl.BlockSpec(shape, index_map, pipeline_mode=pl.Buffered(buffer_count))
    except TypeError:
        return pl.BlockSpec(shape, index_map)


# ---------------------------------------------------------------------------
# Kernel 1: fused QKV projection (scale folded into the Q weight columns).
# ---------------------------------------------------------------------------
def _qkv_proj_kernel(x_ref, w_ref, b_ref, o_ref):
    # One wide-N MXU matmul per (batch, seq-tile, feature-tile) step; f32
    # accumulation, bf16 store (lane-dense output slab).
    o_ref[0] = (
        jnp.dot(x_ref[0], w_ref[...], preferred_element_type=jnp.float32)
        + b_ref[...]
    ).astype(o_ref.dtype)


# ---------------------------------------------------------------------------
# Kernel 2: flash-style attention + output projection, one KV group per step.
# ---------------------------------------------------------------------------
def _gqa_attn_kernel(q_ref, k_ref, v_ref, wo_ref, bo_ref, o_ref,
                     q2_sc, m_sc, l_sc, pv_sc, out_sc,
                     *, factor, head_dim, bf16_exp):
    g = pl.program_id(2)      # KV head (group) index   — reduction ("arbitrary")
    ki = pl.program_id(3)     # KV sequence tile index  — reduction ("arbitrary")
    ng = pl.num_programs(2)
    nk = pl.num_programs(3)
    q_tile = q_ref.shape[1]

    @pl.when(jnp.logical_and(g == 0, ki == 0))
    def _init_out():
        out_sc[...] = jnp.zeros(out_sc.shape, out_sc.dtype)

    @pl.when(ki == 0)
    def _init_group():
        # Hoisted Q repack: the lane-splitting reshape
        # (q_tile, factor*hd) -> (factor*q_tile, hd) is done ONCE per
        # (b, qi, g) into bf16 VMEM scratch instead of once per kv tile.
        # Row r <-> (token r // factor, local head r % factor).
        q2_sc[...] = q_ref[0].reshape(q_tile * factor, head_dim)
        m_sc[...] = jnp.full(m_sc.shape, -jnp.inf, m_sc.dtype)
        l_sc[...] = jnp.zeros(l_sc.shape, l_sc.dtype)
        pv_sc[...] = jnp.zeros(pv_sc.shape, pv_sc.dtype)

    q2 = q2_sc[...]                                           # (factor*q_tile, hd) bf16
    kb = k_ref[0]                                             # (kv_tile, hd) bf16
    vb = v_ref[0]                                             # (kv_tile, hd) bf16

    # Q @ K^T without an explicit transpose: contract head_dim of both sides
    # (verified to lower to a transposed-weight MXU load, not an XLU vxpose).
    s = lax.dot_general(q2, kb, (((1,), (1,)), ((), ())),
                        preferred_element_type=jnp.float32)   # (factor*q_tile, kv_tile)

    # Online softmax update (m/l/acc math stays f32 on every generation).
    m_new = jnp.maximum(m_sc[...], jnp.max(s, axis=-1, keepdims=True))
    alpha = jnp.exp(m_sc[...] - m_new)
    if bf16_exp:
        # v6e/v7x: exp on the bf16 EUP (p is fed to the MXU as bf16 anyway);
        # the row-sum still accumulates in f32.
        p = jnp.exp((s - m_new).astype(jnp.bfloat16))
        p_mxu = p
        p_sum = jnp.sum(p.astype(jnp.float32), axis=-1, keepdims=True)
    else:
        p = jnp.exp(s - m_new)
        p_mxu = p.astype(jnp.bfloat16)
        p_sum = jnp.sum(p, axis=-1, keepdims=True)
    l_sc[...] = alpha * l_sc[...] + p_sum
    pv_sc[...] = alpha * pv_sc[...] + jnp.dot(p_mxu, vb,
                                              preferred_element_type=jnp.float32)
    m_sc[...] = m_new

    @pl.when(ki == nk - 1)
    def _finish_group():
        # Normalize on the EUP, unpack heads back to (q_tile, factor*hd), and
        # fold this group's heads straight into the lane-dense output
        # projection accumulator: out += a_g @ wo[g*factor*hd:(g+1)*factor*hd, :].
        o_heads = pv_sc[...] * pl.reciprocal(l_sc[...], approx=True)
        a = o_heads.reshape(q_tile, factor * head_dim).astype(jnp.bfloat16)
        out_sc[...] += jnp.dot(a, wo_ref[...], preferred_element_type=jnp.float32)

    @pl.when(jnp.logical_and(ki == nk - 1, g == ng - 1))
    def _write_out():
        o_ref[0] = (out_sc[...] + bo_ref[...]).astype(o_ref.dtype)


# ---------------------------------------------------------------------------
# Wrapper
# ---------------------------------------------------------------------------
def group_query_attn_pallas(x, params, q_heads, kv_heads, *,
                            s_tile=None, q_tile=None, kv_tile=None,
                            n_tile=None, bf16_exp=None):
    bs, sl, dim = x.shape
    head_dim = dim // q_heads
    factor = q_heads // kv_heads
    kv_dim = kv_heads * head_dim
    fused_dim = dim + 2 * kv_dim
    wq, bq, wk, bk, wv, bv, wo, bo = params

    # Fold the softmax scale into the Q projection (weight-side, one-time) and
    # fuse Q|K|V into a single wide-N projection.  Cast MXU weight operands
    # and x to bf16 once (halves weight + activation HBM/VMEM traffic).
    scale = 1.0 / math.sqrt(head_dim)
    wqkv = jnp.concatenate([wq * scale, wk, wv], axis=1).astype(jnp.bfloat16)
    bqkv = jnp.concatenate([bq * scale, bk, bv], axis=1).astype(jnp.float32)
    wo_b = wo.astype(jnp.bfloat16)
    x_b = x.astype(jnp.bfloat16)

    if bf16_exp is None:
        bf16_exp = _default_bf16_exp()
    vmem_limit = _vmem_limit_bytes()

    # Sublane/lane-aligned tile defaults (divisors of the true extents).
    s_tile = s_tile or _pick_tile(sl, 512, 8)          # projection seq tile
    q_tile = q_tile or _pick_tile(sl, 256, 8)          # attention query tile
    kv_tile = kv_tile or _pick_tile(sl, 1024, 128)     # attention key/value tile
    n_tile = n_tile or _pick_tile(fused_dim, 1024, 128)  # projection out-feature tile

    # ----- Kernel 1: fused QKV projection, tiled over (batch, seq, out-feat) -----
    qkv = pl.pallas_call(
        _qkv_proj_kernel,
        out_shape=jax.ShapeDtypeStruct((bs, sl, fused_dim), jnp.bfloat16),
        grid=(bs, sl // s_tile, fused_dim // n_tile),
        in_specs=[
            pl.BlockSpec((1, s_tile, dim), lambda b, s, n: (b, s, 0)),
            pl.BlockSpec((dim, n_tile), lambda b, s, n: (0, n)),
            pl.BlockSpec((1, n_tile), lambda b, s, n: (0, n)),
        ],
        out_specs=pl.BlockSpec((1, s_tile, n_tile), lambda b, s, n: (b, s, n)),
        compiler_params=pltpu.CompilerParams(
            dimension_semantics=("parallel", "parallel", "parallel"),
            vmem_limit_bytes=vmem_limit),
    )(x_b, wqkv, bqkv)

    # ----- Kernel 2: attention + output projection -----
    # Q/K/V are read as column slices of the single fused qkv array:
    #   Q block g  -> columns [g*factor*hd, (g+1)*factor*hd)
    #   K head g   -> feature block (q_heads + g)              (hd wide)
    #   V head g   -> feature block (q_heads + kv_heads + g)   (hd wide)
    q_blk = factor * head_dim
    attn = pl.pallas_call(
        functools.partial(_gqa_attn_kernel, factor=factor, head_dim=head_dim,
                          bf16_exp=bf16_exp),
        out_shape=jax.ShapeDtypeStruct((bs, sl, dim), x.dtype),
        grid=(bs, sl // q_tile, kv_heads, sl // kv_tile),
        in_specs=[
            pl.BlockSpec((1, q_tile, q_blk),
                         lambda b, qi, g, ki: (b, qi, g)),
            pl.BlockSpec((1, kv_tile, head_dim),
                         lambda b, qi, g, ki: (b, ki, q_heads + g)),
            pl.BlockSpec((1, kv_tile, head_dim),
                         lambda b, qi, g, ki: (b, ki, q_heads + kv_heads + g)),
            # wo/bo block index depends only on g -> single-buffer to save VMEM.
            _maybe_buffered_spec((q_blk, dim), lambda b, qi, g, ki: (g, 0), 1),
            _maybe_buffered_spec((1, dim), lambda b, qi, g, ki: (0, 0), 1),
        ],
        out_specs=pl.BlockSpec((1, q_tile, dim), lambda b, qi, g, ki: (b, qi, 0)),
        scratch_shapes=[
            pltpu.VMEM((factor * q_tile, head_dim), jnp.bfloat16),  # packed Q (hoisted repack)
            pltpu.VMEM((factor * q_tile, 1), jnp.float32),          # running max
            pltpu.VMEM((factor * q_tile, 1), jnp.float32),          # running sum
            pltpu.VMEM((factor * q_tile, head_dim), jnp.float32),   # running P@V
            pltpu.VMEM((q_tile, dim), jnp.float32),                 # output accumulator
        ],
        compiler_params=pltpu.CompilerParams(
            dimension_semantics=("parallel", "parallel", "arbitrary", "arbitrary"),
            vmem_limit_bytes=vmem_limit),
    )(qkv, qkv, qkv, wo_b, bo)
    return attn


# ---------------------------------------------------------------------------
# Init + pure-JAX reference (transcription of the PyTorch forward)
# ---------------------------------------------------------------------------
def init_linear(key, in_dim, out_dim):
    """PyTorch nn.Linear default init: U(-1/sqrt(in), 1/sqrt(in)). Returns (W^T, b)."""
    kw, kb = jax.random.split(key)
    bound = 1.0 / math.sqrt(in_dim)
    w = jax.random.uniform(kw, (out_dim, in_dim), jnp.float32, -bound, bound)
    b = jax.random.uniform(kb, (1, out_dim), jnp.float32, -bound, bound)
    return w.T, b  # pre-transposed for x @ W^T


def reference_forward(x, params, q_heads, kv_heads):
    bs, sl, dim = x.shape
    head_dim = dim // q_heads
    factor = q_heads // kv_heads
    wq, bq, wk, bk, wv, bv, wo, bo = params

    q = x @ wq + bq
    k = x @ wk + bk
    v = x @ wv + bv

    q = q.reshape(bs, sl, q_heads, head_dim).transpose(0, 2, 1, 3)
    k = k.reshape(bs, sl, kv_heads, head_dim)
    v = v.reshape(bs, sl, kv_heads, head_dim)

    def repetition(t):
        bs_, sl_, nh, hd = t.shape
        return jnp.broadcast_to(t[:, :, :, None, :],
                                (bs_, sl_, nh, factor, hd)).reshape(bs_, sl_, nh * factor, hd)

    k = repetition(k).transpose(0, 2, 1, 3)
    v = repetition(v).transpose(0, 2, 1, 3)

    attn = (q @ jnp.swapaxes(k, 2, 3)) / math.sqrt(head_dim)
    att = jax.nn.softmax(attn, axis=-1)
    a = att @ v
    a = a.transpose(0, 2, 1, 3).reshape(bs, sl, dim)
    return a @ wo + bo


if __name__ == "__main__":
    # Small shapes; head_dim = 128 keeps per-group feature blocks lane-aligned.
    bs, sl = 2, 16
    q_heads, kv_heads = 4, 2
    head_dim = 128
    dim = q_heads * head_dim            # 512
    kv_dim = kv_heads * head_dim        # 256

    key = jax.random.PRNGKey(0)
    kx, kq, kk, kvk, ko = jax.random.split(key, 5)

    x = jax.random.normal(kx, (bs, sl, dim), jnp.float32)

    wq, bq = init_linear(kq, dim, dim)
    wk, bk = init_linear(kk, dim, kv_dim)
    wv, bv = init_linear(kvk, dim, kv_dim)
    wo, bo = init_linear(ko, dim, dim)
    params = (wq, bq, wk, bk, wv, bv, wo, bo)

    ref = reference_forward(x, params, q_heads, kv_heads)

    # 1) Default tiles (single kv tile per group at this tiny sequence length).
    out = jax.block_until_ready(group_query_attn_pallas(x, params, q_heads, kv_heads))
    assert out.shape == (bs, sl, dim)
    max_err = float(jnp.max(jnp.abs(out - ref)))
    # bf16 MXU operands + approximate reciprocal (+ bf16 exp on v6e/v7x) =>
    # loose agreement vs the f32 reference.
    assert jnp.allclose(out, ref, atol=4e-2, rtol=4e-2), \
        f"default tiles mismatch vs reference (max abs err {max_err})"

    # 2) Small tiles: exercises the multi-kv-tile online-softmax and
    #    multi-q-tile / multi-group accumulation paths.
    out2 = jax.block_until_ready(
        group_query_attn_pallas(x, params, q_heads, kv_heads,
                                s_tile=8, q_tile=8, kv_tile=8))
    max_err2 = float(jnp.max(jnp.abs(out2 - ref)))
    assert jnp.allclose(out2, ref, atol=4e-2, rtol=4e-2), \
        f"small tiles mismatch vs reference (max abs err {max_err2})"

    print("KERNEL_OK")
</pallas_src>

<mosaic_0001>
module attributes {stable_mosaic.version = 11 : i64} {
  func.func @_qkv_proj_kernel(%arg0: i32, %arg1: i32, %arg2: i32, %arg3: memref<1x16x512xbf16, #tpu.memory_space<vmem>>, %arg4: memref<512x1024xbf16, #tpu.memory_space<vmem>>, %arg5: memref<1x1024xf32, #tpu.memory_space<vmem>>, %arg6: memref<1x16x1024xbf16, #tpu.memory_space<vmem>>) attributes {dimension_semantics = [#tpu.dimension_semantics<parallel>, #tpu.dimension_semantics<parallel>, #tpu.dimension_semantics<parallel>], iteration_bounds = array<i64: 2, 1, 1>, scalar_prefetch = 0 : i64, scratch_operands = 0 : i64, tpu.core_type = #tpu.core_type<tc>, window_params = [{transform_indices = @transform_0, window_bounds = array<i64: 1, 16, 512>}, {transform_indices = @transform_1, window_bounds = array<i64: 512, 1024>}, {transform_indices = @transform_2, window_bounds = array<i64: 1, 1024>}, {transform_indices = @transform_3, window_bounds = array<i64: 1, 16, 1024>}]} {
    %c0 = arith.constant 0 : index
    %c0_0 = arith.constant 0 : index
    %c0_1 = arith.constant 0 : index
    %0 = vector.load %arg3[%c0, %c0_0, %c0_1] : memref<1x16x512xbf16, #tpu.memory_space<vmem>>, vector<1x16x512xbf16>
    %1 = vector.shape_cast %0 : vector<1x16x512xbf16> to vector<16x512xbf16>
    %c0_2 = arith.constant 0 : index
    %c0_3 = arith.constant 0 : index
    %2 = vector.load %arg4[%c0_2, %c0_3] : memref<512x1024xbf16, #tpu.memory_space<vmem>>, vector<512x1024xbf16>
    %cst = arith.constant dense<0.000000e+00> : vector<16x1024xf32>
    %3 = tpu.matmul %1, %2, %cst {dimension_numbers = #tpu.dot_dimension_numbers<[1], [0], [0], [1], [0, 0, 1, 1], [], []>} : vector<16x512xbf16>, vector<512x1024xbf16>, vector<16x1024xf32> -> vector<16x1024xf32>
    %c0_4 = arith.constant 0 : index
    %c0_5 = arith.constant 0 : index
    %4 = vector.load %arg5[%c0_4, %c0_5] : memref<1x1024xf32, #tpu.memory_space<vmem>>, vector<1x1024xf32>
    %5 = vector.broadcast %4 : vector<1x1024xf32> to vector<16x1024xf32>
    %6 = arith.addf %3, %5 : vector<16x1024xf32>
    %7 = arith.truncf %6 : vector<16x1024xf32> to vector<16x1024xbf16>
    %c0_6 = arith.constant 0 : index
    %c0_7 = arith.constant 0 : index
    %c0_8 = arith.constant 0 : index
    %8 = vector.load %arg6[%c0_6, %c0_7, %c0_8] : memref<1x16x1024xbf16, #tpu.memory_space<vmem>>, vector<1x16x1024xbf16>
    %9 = vector.shape_cast %8 : vector<1x16x1024xbf16> to vector<16x1024xbf16>
    %10 = vector.shape_cast %7 : vector<16x1024xbf16> to vector<1x16x1024xbf16>
    tpu.vector_store %arg6[%c0_6, %c0_7, %c0_8], %10 {strides = array<i32>} : memref<1x16x1024xbf16, #tpu.memory_space<vmem>>, vector<1x16x1024xbf16>,
    return
  }
  func.func @transform_0(%arg0: i32, %arg1: i32, %arg2: i32) -> (i32, i32, i32) {
    %c0_i32 = arith.constant 0 : i32
    %c0_i32_0 = arith.constant 0 : i32
    return %arg0, %arg1, %c0_i32 : i32, i32, i32
  }
  func.func @transform_1(%arg0: i32, %arg1: i32, %arg2: i32) -> (i32, i32) {
    %c0_i32 = arith.constant 0 : i32
    %c0_i32_0 = arith.constant 0 : i32
    return %c0_i32, %arg2 : i32, i32
  }
  func.func @transform_2(%arg0: i32, %arg1: i32, %arg2: i32) -> (i32, i32) {
    %c0_i32 = arith.constant 0 : i32
    %c0_i32_0 = arith.constant 0 : i32
    return %c0_i32, %arg2 : i32, i32
  }
  func.func @transform_3(%arg0: i32, %arg1: i32, %arg2: i32) -> (i32, i32, i32) {
    %c0_i32 = arith.constant 0 : i32
    return %arg0, %arg1, %arg2 : i32, i32, i32
  }
}

</mosaic_0001>

<bundles_post_ra>
// kernel: tpu_custom_call.1
= control target key start
LH: loop header
LB: loop body
LE: loop exit
PB: predicated region body
PF: predicated region fallthrough
CT: control target
= control target key end

     0   :  { %8 = vsyncpa [#allocation3], 0  ;;  %s3326_s0 = inlined_call_operand.hbm [shape: bf16[2,16,512], index: 0, kind: input, shape index: {}]   ;;  %s3327_s1 = inlined_call_operand.hbm [shape: bf16[512,1024], index: 1, kind: input, shape index: {}]   ;;  %s3328_s2 = inlined_call_operand.hbm [shape: f32[1,1024], index: 2, kind: input, shape index: {}]   ;;  %s3329_s3 = inlined_call_operand.hbm [shape: bf16[2,16,1024], index: 3, kind: output, shape index: {}]  }
   0x1   :  { %10 = vsyncpa [#allocation3 + $0x1], 0 }
   0x2   :  { %11 = vsyncpa [#allocation6], 0 }
   0x3   :  { %12 = vsyncpa [#allocation4], 0 }
   0x4   :  { %14 = vsyncpa [#allocation4 + $0x1], 0  ;;  %s3029_s12 = smov 0   ;;  %s3031_s13 = smov 0  }
   0x5   :  { %s3033_s14 = smov 0   ;;  %s3035_s15 = smov 0  }
   0x6   :  { %s3037_s16 = smov 0   ;;  %s3039_s17 = smov 0  }
   0x7 LB: > { %s2401_s18 = sadd.s32 4294967295, %s2997_s17   ;;  %s2402_s19 = sadd.s32 4294967294, %s2997_s17   ;;  %s2997_s17 = sphi %s3039_s17, %s20_s17   ;;  %s2993_s16 = sphi %s3037_s16, %s3351_s16   ;;  %s2989_s15 = sphi %s3035_s15, %s3350_s15   ;;  %s2985_s14 = sphi %s3033_s14, %s3349_s14   ;;  %s2981_s13 = sphi %s3031_s13, %s3348_s13   ;;  %s2977_s12 = sphi %s3029_s12, %s3347_s12  }
   0x8   : > { %p61_p0 = scmp.ne.s32.totalorder %s2981_s13, %s2977_s12  ;;  %p3063_p1 = scmp.eq.s32.totalorder %s2401_s18, 0 }
   0x9   : > { %p3067_p2 = scmp.eq.s32.totalorder %s2401_s18, 1  ;;  %p147_p3 = scmp.eq.s32.totalorder %s2402_s19, 1 }
   0xa   : > { %s3334_s20 = scalar_select %p3063_p1, 1, 0 }
   0xb   : > { %p3073_p4 = por %p3063_p1, %p61_p0  ;;  %p2403_p5 = scmp.ge.s32.totalorder %s2997_s17, 1 }
   0xc   : > { %p3078_p6 = por %p147_p3, %p61_p0  ;;  %p154_p7 = scmp.lt.s32.totalorder %s2997_s17, 3 }
   0xd   : > { %s3336_s22 = scalar_select %p3073_p4, 1, 0 }
   0xe   : > { %s3337_s23 = scalar_select %p3078_p6, 1, 0 }
   0xf   : > { %p3083_p8 = pnand %p2403_p5, %p154_p7  ;;  %s2999_s25 = smov [#allocation5]  }
  0x10   : > { %s169_s26 = sshll.u32 %s2999_s25, 4  ;;  %s3000_s28 = smov [#allocation7]   ;;  %s3087_s26 = int_to_ptr.vmem [resolvable:$true] %s169_s26 }
  0x11   : > { %p2742_p9 = pneg %p3083_p8  ;;  %s186_s29 = sshll.u32 %s3000_s28, 4  ;;  %s3098_s29 = int_to_ptr.vmem [resolvable:$true] %s186_s29 }
  0x12   : > { %s2825_s5 = scalar_lea.hbm %s3327_s1, 32768 }
  0x13   : > { %p3094_p11 = pnand %p2742_p9, %p3063_p1  ;;  %p2826_p12 = scmp.ne.s32.totalorder %s3327_s1, %s2825_s5 }
  0x14   : > { %p2832_p5 = scmp.lt.u32.totalorder %s2825_s5, %s3327_s1 }
  0x15   : > { %p2827_p13 = pneg %p3094_p11 }
  0x17   : > { %p2828_p0 = pnand %p2827_p13, %p2826_p12 }
  0x19   : > { %p2829_p3 = pneg %p2828_p0 }
  0x1b   : > { %p2834_p7 = pnand %p2832_p5, %p2829_p3 }
  0x1d   : > { %2837 = shalt.err (!%p2834_p7)
}
  0x1e   : > { %s2838_s10 = scalar_lea.vmem %s3087_s26, 32768  ;;  %p2846_p1 = scmp.lt.s32.totalorder %s3087_s26, %s3087_s26 }
  0x1f   : > { %p2839_p9 = scmp.ne.s32.totalorder %s3087_s26, %s2838_s10  ;;  %p2847_p12 = scmp.lt.s32.totalorder %s2838_s10, %s2838_s10 }
  0x21   : > { %p2841_p10 = pnand %p2839_p9, %p2827_p13  ;;  %p2848_p0 = por %p2847_p12, %p2846_p1 }
  0x23   : > { %p2842_p6 = pneg %p2841_p10 }
  0x25   : > { %p2849_p4 = pnand %p2848_p0, %p2842_p6 }
  0x27   : > { %2852 = shalt.err (!%p2849_p4)
}
  0x28   : > { %s3001_s11 = smov 512   ;;  %s3002_s18 = smov 32  }
  0x29   : > { %2745 = dma.hbm_to_vmem [thread:$0]  (!%p3094_p11), %s3327_s1, 32768, %s3087_s26, [#allocation6], %s3001_s11, %s3001_s11, %s3002_s18  }
  0x2a   : > { %s2853_s4 = scalar_lea.hbm %s3328_s2, 128 }
  0x2b   : > { %p2854_p1 = scmp.ne.s32.totalorder %s3328_s2, %s2853_s4  ;;  %p2860_p10 = scmp.lt.u32.totalorder %s2853_s4, %s3328_s2 }
  0x2d   : > { %p2856_p4 = pnand %p2854_p1, %p2827_p13 }
  0x2f   : > { %p2857_p6 = pneg %p2856_p4 }
  0x31   : > { %p2862_p3 = pnand %p2860_p10, %p2857_p6 }
  0x33   : > { %2865 = shalt.err (!%p2862_p3)
}
  0x34   : > { %s2866_s26 = scalar_lea.vmem %s3098_s29, 128  ;;  %p2874_p12 = scmp.lt.s32.totalorder %s3098_s29, %s3098_s29 }
  0x35   : > { %p2867_p5 = scmp.ne.s32.totalorder %s3098_s29, %s2866_s26  ;;  %p2875_p0 = scmp.lt.s32.totalorder %s2866_s26, %s2866_s26 }
  0x37   : > { %p2869_p7 = pnand %p2867_p5, %p2827_p13  ;;  %p2876_p1 = por %p2875_p0, %p2874_p12 }
  0x39   : > { %p2870_p9 = pneg %p2869_p7 }
  0x3b   : > { %p2877_p4 = pnand %p2876_p1, %p2870_p9 }
  0x3d   : > { %2880 = shalt.err (!%p2877_p4)
}
  0x3e   : > { %2748 = dma.hbm_to_vmem [thread:$0]  (!%p3094_p11), %s3328_s2, 128, %s3098_s29, [#allocation6]  }
  0x3f   : > { %s39_s11 = sadd.s32 1, %s2993_s16  ;;  %s48_s18 = sadd.s32 1, %s2985_s14 }
  0x40   : > { %p41_p13 = scmp.ge.s32.totalorder %s39_s11, 2  ;;  %p55_p6 = scmp.ne.s32.totalorder %s2985_s14, %s2981_s13 }
  0x41   : > { %p56_p10 = scmp.eq.s32.totalorder %s2997_s17, 0  ;;  %p2759_p3 = scmp.lt.s32.totalorder %s2997_s17, 2 }
  0x42   : > { %s3353_s11 = smov (%p41_p13, %s39_s11), 0  ;;  %p3162_p7 = por %p3067_p2, %p55_p6 }
  0x43   : > { %p57_p5 = por %p56_p10, %p55_p6  ;;  %s43_s19 = ssub.s32 %s2993_s16, %s3353_s11 }
  0x44   : > { %s3340_s27 = scalar_select %p3162_p7, 1, 0 }
  0x45   : > { %s197_s25 = sand.u32 1, %s2985_s14   ;;  %p46_p9 = scmp.eq.s32.totalorder %s43_s19, 0 }
  0x46   : > { %s2407_s29 = sshll.u32 %s197_s25, 5  ;;  %s2688_s28 = sshll.u32 %s2993_s16, 9 }
  0x47   : > { %s3171_s30 = scalar_select %p46_p9, %s2985_s14, %s48_s18  }
  0x48   : > { %s3176_s6 = scalar_lea.hbm %s3326_s0, %s2688_s28  ;;  %s201_s21 = scalar_lea.vmem [#allocation2], %s2407_s29 }
  0x49   : > { %s211_s7 = sshll.u32 %s201_s21, 4  ;;  %p3180_p2 = pnand %p2759_p3, %p57_p5  ;;  %s3184_s7 = int_to_ptr.vmem [resolvable:$true] %s211_s7 }
  0x4a   : > { %s3186_s26 = scalar_lea.sflag [#allocation3], %s197_s25  ;;  %s2881_s9 = scalar_lea.hbm %s3176_s6, 512 }
  0x4b   : > { %p2882_p11 = scmp.ne.s32.totalorder %s3176_s6, %s2881_s9  ;;  %p2883_p12 = pneg %p3180_p2 }
  0x4c   : > { %s2886_s19 = scalar_lea.hbm %s3326_s0, 1024  ;;  %p2887_p4 = scmp.lt.u32.totalorder %s3176_s6, %s3326_s0 }
  0x4d   : > { %p2884_p0 = pnand %p2883_p12, %p2882_p11  ;;  %p2888_p13 = scmp.lt.u32.totalorder %s2886_s19, %s2881_s9 }
  0x4e   : > { %p2890_p10 = scmp.lt.u32.totalorder %s2881_s9, %s3176_s6 }
  0x4f   : > { %p2885_p1 = pneg %p2884_p0  ;;  %p2889_p6 = por %p2888_p13, %p2887_p4 }
  0x51   : > { %p2891_p3 = por %p2890_p10, %p2889_p6 }
  0x53   : > { %p2892_p5 = pnand %p2891_p3, %p2885_p1 }
  0x55   : > { %2895 = shalt.err (!%p2892_p5)
}
  0x56   : > { %s2896_s25 = scalar_lea.vmem %s3184_s7, 512  ;;  %s3003_s4 = smov [#allocation2]  }
  0x57   : > { %p2897_p9 = scmp.ne.s32.totalorder %s3184_s7, %s2896_s25  ;;  %s2901_s5 = sshll.u32 %s3003_s4, 4  ;;  %s2902_s5 = int_to_ptr.vmem [resolvable:$false] %s2901_s5 }
  0x58   : > { %s2903_s21 = scalar_lea.vmem %s2902_s5, 1024  ;;  %p2904_p7 = scmp.lt.s32.totalorder %s3184_s7, %s2902_s5 }
  0x59   : > { %p2899_p11 = pnand %p2897_p9, %p2883_p12  ;;  %p2905_p4 = scmp.lt.s32.totalorder %s2903_s21, %s2896_s25 }
  0x5b   : > { %p2900_p0 = pneg %p2899_p11  ;;  %p2906_p13 = por %p2905_p4, %p2904_p7 }
  0x5d   : > { %p2907_p6 = pnand %p2906_p13, %p2900_p0 }
  0x5f   : > { %2910 = shalt.err (!%p2907_p6)
}
  0x60   : > { %s3004_s9 = smov 256   ;;  %s3005_s10 = smov 16  }
  0x61   : > { %2752 = dma.hbm_to_vmem [thread:$0]  (!%p3180_p2), %s3176_s6, 512, %s3184_s7, %s3186_s26, %s3004_s9, %s3004_s9, %s3005_s10  }
  0x62   : > { %223 = sbr.rel (%p3083_p8) target bundleno = 603 (0x25b), region = 32  ;;  %s3217_s18 = sand.u32 (!%p3083_p8), 1, %s2981_s13  }
  0x63   : > { %s2411_s19 = sshll.u32 (!%p3083_p8), %s3217_s18, 5  ;;  %s226_s29 = scalar_lea.sflag (!%p3083_p8), [#allocation3], %s3217_s18 }
  0x64   : > { %s3221_s28 = scalar_lea.vmem (!%p3083_p8), [#allocation2], %s2411_s19  ;;  %p3342_p7 = scmp.ne.s32.totalorder (!%p3083_p8), %s3336_s22, 0 }
  0x69   : > { %2964 = dma.done.wait (%p3342_p7), %s226_s29, 512  }
  0x6a   : > { %2966 = vsyncadd (%p3342_p7), %s226_s29, 4294966784  ;;  %p3343_p2 = scmp.ne.s32.totalorder %s3334_s20, 0 }
  0x6c   : > { %2968 = dma.done.wait (%p3343_p2), [#allocation6], 32896  }
  0x6d   : > { %2970 = vsyncadd (%p3343_p2), [#allocation6], 4294934400  ;;  %v269_v0 = vld [vmem:[#allocation5] sm:$0xff]  ;;  %v270_v2 = vld [vmem:[#allocation5 + $0x8] sm:$0xff]  ;;  %s2414_s20 = sshll.u32 %s3217_s18, 6  ;;  %s2697_s6 = sshll.u32 %s2989_s15, 10 }
  0x6e   : > { %v273_v1 = vld [vmem:[#allocation5 + $0x20] sm:$0xff]  ;;  %v274_v4 = vld [vmem:[#allocation5 + $0x28] sm:$0xff]  ;;  %s3260_s22 = scalar_lea.vmem [#allocation8], %s2414_s20  ;;  %s3274_s26 = scalar_lea.hbm %s3329_s3, %s2697_s6 }
  0x6f   : > { %v2420_v3 = vcombine.high %v269_v0, %v273_v1  ;;  %v2419_v5 = vcombine.low %v269_v0, %v273_v1  ;;  %v277_v6 = vld [vmem:[#allocation5 + $0x40] sm:$0xff]  ;;  %v2422_v8 = vcombine.high %v270_v2, %v274_v4  ;;  %v2421_v9 = vcombine.low %v270_v2, %v274_v4  ;;  %v278_v11 = vld [vmem:[#allocation5 + $0x48] sm:$0xff]  ;;  %s2286_s24 = sshll.u32 %s3260_s22, 4  ;;  %s2268_s15 = scalar_lea.sflag [#allocation4], %s3217_s18  ;;  %s3268_s24 = int_to_ptr.vmem [resolvable:$true] %s2286_s24 }
  0x70   : > { %v281_v7 = vld [vmem:[#allocation5 + $0x60] sm:$0xff]  ;;  %v282_v12 = vld [vmem:[#allocation5 + $0x68] sm:$0xff]  ;;  %s2911_s25 = scalar_lea.vmem %s3268_s24, 1024  ;;  %p3344_p12 = scmp.ne.s32.totalorder %s3340_s27, 0 }
  0x71   : > { %v2428_v10 = vcombine.high %v277_v6, %v281_v7  ;;  %v285_v13 = vld [vmem:[#allocation5 + $0x80] sm:$0xff]  ;;  %1867 = vmatprep.subr.bf16.mxu0 %v2420_v3  ;;  %v2430_v14 = vcombine.high %v278_v11, %v282_v12  ;;  %v286_v16 = vld [vmem:[#allocation5 + $0x88] sm:$0xff]  ;;  %1953 = vmatprep.subr.bf16.mxu1 %v2422_v8  ;;  %v2427_v18 = vcombine.low %v277_v6, %v281_v7  ;;  %p2912_p8 = scmp.ne.s32.totalorder %s3268_s24, %s2911_s25  ;;  %s3006_s4 = smov [#allocation8]  }
  0x72   : > { %v289_v15 = vld [vmem:[#allocation5 + $0xa0] sm:$0xff]  ;;  %v290_v17 = vld [vmem:[#allocation5 + $0xa8] sm:$0xff]  ;;  %1868 = vmatpush1.bf16.msra.mxu0 %v2419_v5  ;;  %1954 = vmatpush1.bf16.msra.mxu1 %v2421_v9  ;;  %v2429_v19 = vcombine.low %v278_v11, %v282_v12  ;;  %s2915_s5 = sshll.u32 %s3006_s4, 4  ;;  %s2916_s5 = int_to_ptr.vmem [resolvable:$false] %s2915_s5 }
  0x73   : > { %1869 = vmatprep.subr.bf16.mxu0 %v2428_v10  ;;  %v2436_v20 = vcombine.high %v285_v13, %v289_v15  ;;  %1955 = vmatprep.subr.bf16.mxu1 %v2430_v14  ;;  %v2438_v21 = vcombine.high %v286_v16, %v290_v17  ;;  %v293_v22 = vld [vmem:[#allocation5 + $0xc0] sm:$0xff]  ;;  %v294_v24 = vld [vmem:[#allocation5 + $0xc8] sm:$0xff]  ;;  %v2435_v26 = vcombine.low %v285_v13, %v289_v15  ;;  %p2913_p1 = pnand %p2912_p8, %p3344_p12  ;;  %s2917_s21 = scalar_lea.vmem %s2916_s5, 2048 }
  0x74   : > { %v297_v23 = vld [vmem:[#allocation5 + $0xe0] sm:$0xff]  ;;  %v298_v25 = vld [vmem:[#allocation5 + $0xe8] sm:$0xff]  ;;  %v2437_v27 = vcombine.low %v286_v16, %v290_v17  ;;  %p2918_p3 = scmp.lt.s32.totalorder %s3268_s24, %s2916_s5  ;;  %p2919_p5 = scmp.lt.s32.totalorder %s2917_s21, %s2911_s25 }
  0x75   : > { %v2444_v28 = vcombine.high %v293_v22, %v297_v23  ;;  %v2446_v29 = vcombine.high %v294_v24, %v298_v25  ;;  %v301_v30 = vld [vmem:[#allocation5 + $0x100] sm:$0xff]  ;;  %v302_v32 = vld [vmem:[#allocation5 + $0x108] sm:$0xff]  ;;  %v2443_v34 = vcombine.low %v293_v22, %v297_v23  ;;  %v2445_v35 = vcombine.low %v294_v24, %v298_v25  ;;  %p2914_p10 = pneg %p2913_p1 }
  0x76   : > { %1870 = vmatpush1.bf16.msra.mxu0 %v2427_v18  ;;  %1956 = vmatpush1.bf16.msra.mxu1 %v2429_v19  ;;  %v305_v31 = vld [vmem:[#allocation5 + $0x120] sm:$0xff]  ;;  %v306_v33 = vld [vmem:[#allocation5 + $0x128] sm:$0xff]  ;;  %p2920_p9 = por %p2919_p5, %p2918_p3 }
  0x77   : > { %1871 = vmatprep.subr.bf16.mxu0 %v2436_v20  ;;  %1957 = vmatprep.subr.bf16.mxu1 %v2438_v21  ;;  %v2452_v36 = vcombine.high %v301_v30, %v305_v31  ;;  %v2454_v37 = vcombine.high %v302_v32, %v306_v33  ;;  %v309_v38 = vld [vmem:[#allocation5 + $0x140] sm:$0xff]  ;;  %v310_v40 = vld [vmem:[#allocation5 + $0x148] sm:$0xff]  ;;  %v2451_v42 = vcombine.low %v301_v30, %v305_v31 }
  0x78   : > { %v313_v39 = vld [vmem:[#allocation5 + $0x160] sm:$0xff]  ;;  %v314_v41 = vld [vmem:[#allocation5 + $0x168] sm:$0xff]  ;;  %v2453_v43 = vcombine.low %v302_v32, %v306_v33  ;;  %p2921_p11 = pnand %p2920_p9, %p2914_p10 }
  0x79   : > { %v2460_v44 = vcombine.high %v309_v38, %v313_v39  ;;  %v2462_v45 = vcombine.high %v310_v40, %v314_v41  ;;  %v317_v46 = vld [vmem:[#allocation5 + $0x180] sm:$0xff]  ;;  %v318_v48 = vld [vmem:[#allocation5 + $0x188] sm:$0xff]  ;;  %v2459_v50 = vcombine.low %v309_v38, %v313_v39  ;;  %v2461_v51 = vcombine.low %v310_v40, %v314_v41 }
  0x7a   : > { %1872 = vmatpush1.bf16.msra.mxu0 %v2435_v26  ;;  %1958 = vmatpush1.bf16.msra.mxu1 %v2437_v27  ;;  %v321_v47 = vld [vmem:[#allocation5 + $0x1a0] sm:$0xff]  ;;  %v322_v49 = vld [vmem:[#allocation5 + $0x1a8] sm:$0xff] }
  0x7b   : > { %1873 = vmatprep.subr.bf16.mxu0 %v2444_v28  ;;  %1959 = vmatprep.subr.bf16.mxu1 %v2446_v29  ;;  %v2468_v52 = vcombine.high %v317_v46, %v321_v47  ;;  %v2470_v53 = vcombine.high %v318_v48, %v322_v49  ;;  %v325_v54 = vld [vmem:[#allocation5 + $0x1c0] sm:$0xff]  ;;  %v326_v57 = vld [vmem:[#allocation5 + $0x1c8] sm:$0xff]  ;;  %v2467_v59 = vcombine.low %v317_v46, %v321_v47 }
  0x7c   : > { %v329_v55 = vld [vmem:[#allocation5 + $0x1e0] sm:$0xff]  ;;  %v330_v58 = vld [vmem:[#allocation5 + $0x1e8] sm:$0xff]  ;;  %v2469_v60 = vcombine.low %v318_v48, %v322_v49 }
  0x7d   : > { %v3232_v56 = vld [vmem:[%s3221_s28 + $0x4] ss:$16 sps:$4 sm:$0xff]   ;;  %v2476_v61 = vcombine.high %v325_v54, %v329_v55  ;;  %v2478_v62 = vcombine.high %v326_v57, %v330_v58  ;;  %v334_v1 = vld [vmem:[#allocation5 + $0x208] sm:$0xff]  ;;  %v2475_v3 = vcombine.low %v325_v54, %v329_v55  ;;  %v2477_v4 = vcombine.low %v326_v57, %v330_v58 }
  0x7e   : > { %1874 = vmatpush1.bf16.msra.mxu0 %v2443_v34  ;;  %1960 = vmatpush1.bf16.msra.mxu1 %v2445_v35  ;;  %v333_v63 = vld [vmem:[#allocation5 + $0x200] sm:$0xff]  ;;  %v338_v2 = vld [vmem:[#allocation5 + $0x228] sm:$0xff] }
  0x7f   : > { %1875 = vmatprep.subr.bf16.mxu0 %v2452_v36  ;;  %1961 = vmatprep.subr.bf16.mxu1 %v2454_v37  ;;  %v337_v0 = vld [vmem:[#allocation5 + $0x220] sm:$0xff]  ;;  %v2486_v6 = vcombine.high %v334_v1, %v338_v2  ;;  %v342_v9 = vld [vmem:[#allocation5 + $0x248] sm:$0xff]  ;;  %v2485_v12 = vcombine.low %v334_v1, %v338_v2 }
  0x80   : > { %1899 = vmatprep.mubr.bf16.mxu0 %v3232_v56  ;;  %1985 = vmatprep.mubr.bf16.mxu1 %v3232_v56  ;;  %v2484_v5 = vcombine.high %v333_v63, %v337_v0  ;;  %v341_v7 = vld [vmem:[#allocation5 + $0x240] sm:$0xff]  ;;  %v346_v10 = vld [vmem:[#allocation5 + $0x268] sm:$0xff]  ;;  %v2483_v11 = vcombine.low %v333_v63, %v337_v0 }
  0x81   : > { %v345_v8 = vld [vmem:[#allocation5 + $0x260] sm:$0xff]  ;;  %v2494_v14 = vcombine.high %v342_v9, %v346_v10  ;;  %v350_v17 = vld [vmem:[#allocation5 + $0x288] sm:$0xff]  ;;  %v2493_v20 = vcombine.low %v342_v9, %v346_v10 }
  0x82   : > { %1876 = vmatpush1.bf16.msra.mxu0 %v2451_v42  ;;  %1962 = vmatpush1.bf16.msra.mxu1 %v2453_v43  ;;  %v2492_v13 = vcombine.high %v341_v7, %v345_v8  ;;  %v349_v15 = vld [vmem:[#allocation5 + $0x280] sm:$0xff]  ;;  %v354_v18 = vld [vmem:[#allocation5 + $0x2a8] sm:$0xff]  ;;  %v2491_v19 = vcombine.low %v341_v7, %v345_v8 }
  0x83   : > { %1877 = vmatprep.subr.bf16.mxu0 %v2460_v44  ;;  %1963 = vmatprep.subr.bf16.mxu1 %v2462_v45  ;;  %v353_v16 = vld [vmem:[#allocation5 + $0x2a0] sm:$0xff]  ;;  %v2502_v22 = vcombine.high %v350_v17, %v354_v18  ;;  %v358_v25 = vld [vmem:[#allocation5 + $0x2c8] sm:$0xff]  ;;  %v2501_v28 = vcombine.low %v350_v17, %v354_v18 }
  0x84   : > { %v2500_v21 = vcombine.high %v349_v15, %v353_v16  ;;  %v357_v23 = vld [vmem:[#allocation5 + $0x2c0] sm:$0xff]  ;;  %v362_v26 = vld [vmem:[#allocation5 + $0x2e8] sm:$0xff]  ;;  %v2499_v27 = vcombine.low %v349_v15, %v353_v16 }
  0x85   : > { %v361_v24 = vld [vmem:[#allocation5 + $0x2e0] sm:$0xff]  ;;  %v2510_v30 = vcombine.high %v358_v25, %v362_v26  ;;  %v366_v33 = vld [vmem:[#allocation5 + $0x308] sm:$0xff]  ;;  %v2509_v36 = vcombine.low %v358_v25, %v362_v26 }
  0x86   : > { %1878 = vmatpush1.bf16.msra.mxu0 %v2459_v50  ;;  %1964 = vmatpush1.bf16.msra.mxu1 %v2461_v51  ;;  %v2508_v29 = vcombine.high %v357_v23, %v361_v24  ;;  %v365_v31 = vld [vmem:[#allocation5 + $0x300] sm:$0xff]  ;;  %v370_v34 = vld [vmem:[#allocation5 + $0x328] sm:$0xff]  ;;  %v2507_v35 = vcombine.low %v357_v23, %v361_v24 }
  0x87   : > { %1879 = vmatprep.subr.bf16.mxu0 %v2468_v52  ;;  %1965 = vmatprep.subr.bf16.mxu1 %v2470_v53  ;;  %v369_v32 = vld [vmem:[#allocation5 + $0x320] sm:$0xff]  ;;  %v2518_v38 = vcombine.high %v366_v33, %v370_v34  ;;  %v374_v41 = vld [vmem:[#allocation5 + $0x348] sm:$0xff]  ;;  %v2517_v44 = vcombine.low %v366_v33, %v370_v34 }
  0x88   : > { %v2516_v37 = vcombine.high %v365_v31, %v369_v32  ;;  %v373_v39 = vld [vmem:[#allocation5 + $0x340] sm:$0xff]  ;;  %v378_v42 = vld [vmem:[#allocation5 + $0x368] sm:$0xff]  ;;  %v2515_v43 = vcombine.low %v365_v31, %v369_v32 }
  0x89   : > { %v377_v40 = vld [vmem:[#allocation5 + $0x360] sm:$0xff]  ;;  %v2526_v46 = vcombine.high %v374_v41, %v378_v42  ;;  %v382_v49 = vld [vmem:[#allocation5 + $0x388] sm:$0xff]  ;;  %v2525_v52 = vcombine.low %v374_v41, %v378_v42 }
  0x8a   : > { %1880 = vmatpush1.bf16.msra.mxu0 %v2467_v59  ;;  %1966 = vmatpush1.bf16.msra.mxu1 %v2469_v60  ;;  %v2524_v45 = vcombine.high %v373_v39, %v377_v40  ;;  %v381_v47 = vld [vmem:[#allocation5 + $0x380] sm:$0xff]  ;;  %v386_v50 = vld [vmem:[#allocation5 + $0x3a8] sm:$0xff]  ;;  %v2523_v51 = vcombine.low %v373_v39, %v377_v40 }
  0x8b   : > { %1881 = vmatprep.subr.bf16.mxu0 %v2476_v61  ;;  %1967 = vmatprep.subr.bf16.mxu1 %v2478_v62  ;;  %v385_v48 = vld [vmem:[#allocation5 + $0x3a0] sm:$0xff]  ;;  %v2534_v54 = vcombine.high %v382_v49, %v386_v50  ;;  %v390_v58 = vld [vmem:[#allocation5 + $0x3c8] sm:$0xff]  ;;  %v2533_v61 = vcombine.low %v382_v49, %v386_v50 }
  0x8c   : > { %v2532_v53 = vcombine.high %v381_v47, %v385_v48  ;;  %v389_v55 = vld [vmem:[#allocation5 + $0x3c0] sm:$0xff]  ;;  %v394_v59 = vld [vmem:[#allocation5 + $0x3e8] sm:$0xff]  ;;  %v2531_v60 = vcombine.low %v381_v47, %v385_v48 }
  0x8d   : > { %v393_v57 = vld [vmem:[#allocation5 + $0x3e0] sm:$0xff]  ;;  %v2542_v63 = vcombine.high %v390_v58, %v394_v59  ;;  %v398_v2 = vld [vmem:[#allocation5 + $0x408] sm:$0xff] }
  0x8e   : > { %1882 = vmatpush1.bf16.msra.mxu0 %v2475_v3  ;;  %1968 = vmatpush1.bf16.msra.mxu1 %v2477_v4  ;;  %v2540_v62 = vcombine.high %v389_v55, %v393_v57  ;;  %v397_v0 = vld [vmem:[#allocation5 + $0x400] sm:$0xff]  ;;  %v402_v3 = vld [vmem:[#allocation5 + $0x428] sm:$0xff]  ;;  %v2539_v4 = vcombine.low %v389_v55, %v393_v57 }
  0x8f   : > { %1883 = vmatprep.subr.bf16.mxu0 %v2484_v5  ;;  %1969 = vmatprep.subr.bf16.mxu1 %v2486_v6  ;;  %v401_v1 = vld [vmem:[#allocation5 + $0x420] sm:$0xff]  ;;  %v2541_v5 = vcombine.low %v390_v58, %v394_v59  ;;  %v2550_v7 = vcombine.high %v398_v2, %v402_v3 }
  0x90   : > { %v2548_v6 = vcombine.high %v397_v0, %v401_v1  ;;  %v405_v8 = vld [vmem:[#allocation5 + $0x440] sm:$0xff] }
  0x91   : > { %v409_v9 = vld [vmem:[#allocation5 + $0x460] sm:$0xff] }
  0x92   : > { %1884 = vmatpush1.bf16.msra.mxu0 %v2483_v11  ;;  %1970 = vmatpush1.bf16.msra.mxu1 %v2485_v12  ;;  %v3237_v10 = vld [vmem:[%s3221_s28] ss:$16 sps:$4 sm:$0xff]   ;;  %v406_v11 = vld [vmem:[#allocation5 + $0x448] sm:$0xff]  ;;  %v2556_v15 = vcombine.high %v405_v8, %v409_v9 }
  0x93   : > { %1885 = vmatprep.subr.bf16.mxu0 %v2492_v13  ;;  %1971 = vmatprep.subr.bf16.mxu1 %v2494_v14  ;;  %v410_v12 = vld [vmem:[#allocation5 + $0x468] sm:$0xff]  ;;  %v2547_v13 = vcombine.low %v397_v0, %v401_v1  ;;  %v2549_v14 = vcombine.low %v398_v2, %v402_v3  ;;  %v413_v17 = vld [vmem:[#allocation5 + $0x480] sm:$0xff] }
  0x94   : > { %v2558_v16 = vcombine.high %v406_v11, %v410_v12  ;;  %v417_v18 = vld [vmem:[#allocation5 + $0x4a0] sm:$0xff]  ;;  %v2557_v23 = vcombine.low %v406_v11, %v410_v12 }
  0x95   : > { %v2564_v24 = vcombine.high %v413_v17, %v417_v18  ;;  %v421_v26 = vld [vmem:[#allocation5 + $0x4c0] sm:$0xff] }
  0x96   : > { %1886 = vmatpush1.bf16.msra.mxu0 %v2491_v19  ;;  %1972 = vmatpush1.bf16.msra.mxu1 %v2493_v20  ;;  %v3240_v19 = vld [vmem:[%s3221_s28 + $0xc] ss:$16 sps:$4 sm:$0xff]   ;;  %v429_v34 = vld [vmem:[#allocation5 + $0x500] sm:$0xff] }
  0x97   : > { %1887 = vmatprep.subr.bf16.mxu0 %v2500_v21  ;;  %1973 = vmatprep.subr.bf16.mxu1 %v2502_v22  ;;  %v414_v20 = vld [vmem:[#allocation5 + $0x488] sm:$0xff]  ;;  %v2555_v22 = vcombine.low %v405_v8, %v409_v9  ;;  %v437_v42 = vld [vmem:[#allocation5 + $0x540] sm:$0xff] }
  0x98   : > { %v418_v21 = vld [vmem:[#allocation5 + $0x4a8] sm:$0xff]  ;;  %v445_v50 = vld [vmem:[#allocation5 + $0x580] sm:$0xff] }
  0x99   : > { %v2566_v25 = vcombine.high %v414_v20, %v418_v21  ;;  %v2565_v31 = vcombine.low %v414_v20, %v418_v21  ;;  %v453_v59 = vld [vmem:[#allocation5 + $0x5c0] sm:$0xff] }
  0x9a   : > { %1888 = vmatpush1.bf16.msra.mxu0 %v2499_v27  ;;  %1974 = vmatpush1.bf16.msra.mxu1 %v2501_v28  ;;  %v425_v27 = vld [vmem:[#allocation5 + $0x4e0] sm:$0xff]  ;;  %v422_v28 = vld [vmem:[#allocation5 + $0x4c8] sm:$0xff] }
  0x9b   : > { %1889 = vmatprep.subr.bf16.mxu0 %v2508_v29  ;;  %1975 = vmatprep.subr.bf16.mxu1 %v2510_v30  ;;  %v426_v29 = vld [vmem:[#allocation5 + $0x4e8] sm:$0xff]  ;;  %v2563_v30 = vcombine.low %v413_v17, %v417_v18  ;;  %v2572_v32 = vcombine.high %v421_v26, %v425_v27  ;;  %v461_v3 = vld [vmem:[#allocation5 + $0x600] sm:$0xff] }
  0x9c   : > { %v2574_v33 = vcombine.high %v422_v28, %v426_v29  ;;  %v2573_v39 = vcombine.low %v422_v28, %v426_v29  ;;  %v469_v12 = vld [vmem:[#allocation5 + $0x640] sm:$0xff] }
  0x9d   : > { %v477_v21 = vld [vmem:[#allocation5 + $0x680] sm:$0xff] }
  0x9e   : > { %1890 = vmatpush1.bf16.msra.mxu0 %v2507_v35  ;;  %1976 = vmatpush1.bf16.msra.mxu1 %v2509_v36  ;;  %v433_v35 = vld [vmem:[#allocation5 + $0x520] sm:$0xff]  ;;  %v430_v36 = vld [vmem:[#allocation5 + $0x508] sm:$0xff] }
  0x9f   : > { %1891 = vmatprep.subr.bf16.mxu0 %v2516_v37  ;;  %1977 = vmatprep.subr.bf16.mxu1 %v2518_v38  ;;  %v434_v37 = vld [vmem:[#allocation5 + $0x528] sm:$0xff]  ;;  %v2571_v38 = vcombine.low %v421_v26, %v425_v27  ;;  %v2580_v40 = vcombine.high %v429_v34, %v433_v35  ;;  %v485_v29 = vld [vmem:[#allocation5 + $0x6c0] sm:$0xff] }
  0xa0   : > { %v2582_v41 = vcombine.high %v430_v36, %v434_v37  ;;  %v2581_v47 = vcombine.low %v430_v36, %v434_v37  ;;  %v493_v37 = vld [vmem:[#allocation5 + $0x700] sm:$0xff] }
  0xa2   : > { %1892 = vmatpush1.bf16.msra.mxu0 %v2515_v43  ;;  %1978 = vmatpush1.bf16.msra.mxu1 %v2517_v44  ;;  %v441_v43 = vld [vmem:[#allocation5 + $0x560] sm:$0xff]  ;;  %v438_v44 = vld [vmem:[#allocation5 + $0x548] sm:$0xff] }
  0xa3   : > { %1893 = vmatprep.subr.bf16.mxu0 %v2524_v45  ;;  %1979 = vmatprep.subr.bf16.mxu1 %v2526_v46  ;;  %v442_v45 = vld [vmem:[#allocation5 + $0x568] sm:$0xff]  ;;  %v2579_v46 = vcombine.low %v429_v34, %v433_v35  ;;  %v2588_v48 = vcombine.high %v437_v42, %v441_v43 }
  0xa4   : > { %v2590_v49 = vcombine.high %v438_v44, %v442_v45  ;;  %v2589_v55 = vcombine.low %v438_v44, %v442_v45  ;;  %v501_v45 = vld [vmem:[#allocation5 + $0x740] sm:$0xff] }
  0xa6   : > { %1894 = vmatpush1.bf16.msra.mxu0 %v2523_v51  ;;  %1980 = vmatpush1.bf16.msra.mxu1 %v2525_v52  ;;  %v449_v51 = vld [vmem:[#allocation5 + $0x5a0] sm:$0xff]  ;;  %v446_v52 = vld [vmem:[#allocation5 + $0x588] sm:$0xff] }
  0xa7   : > { %1895 = vmatprep.subr.bf16.mxu0 %v2532_v53  ;;  %1981 = vmatprep.subr.bf16.mxu1 %v2534_v54  ;;  %v450_v53 = vld [vmem:[#allocation5 + $0x5a8] sm:$0xff]  ;;  %v2587_v54 = vcombine.low %v437_v42, %v441_v43  ;;  %v2596_v57 = vcombine.high %v445_v50, %v449_v51 }
  0xa8   : > { %v2598_v58 = vcombine.high %v446_v52, %v450_v53  ;;  %v2597_v0 = vcombine.low %v446_v52, %v450_v53  ;;  %v509_v53 = vld [vmem:[#allocation5 + $0x780] sm:$0xff] }
  0xaa   : > { %1896 = vmatpush1.bf16.msra.mxu0 %v2531_v60  ;;  %1982 = vmatpush1.bf16.msra.mxu1 %v2533_v61  ;;  %v457_v60 = vld [vmem:[#allocation5 + $0x5e0] sm:$0xff]  ;;  %v454_v61 = vld [vmem:[#allocation5 + $0x5c8] sm:$0xff] }
  0xab   : > { %1897 = vmatprep.subr.bf16.mxu0 %v2540_v62  ;;  %1983 = vmatprep.subr.bf16.mxu1 %v2542_v63  ;;  %v458_v62 = vld [vmem:[#allocation5 + $0x5e8] sm:$0xff]  ;;  %v2595_v63 = vcombine.low %v445_v50, %v449_v51  ;;  %v2604_v1 = vcombine.high %v453_v59, %v457_v60 }
  0xac   : > { %v2606_v2 = vcombine.high %v454_v61, %v458_v62  ;;  %v2605_v8 = vcombine.low %v454_v61, %v458_v62  ;;  %v517_v62 = vld [vmem:[#allocation5 + $0x7c0] sm:$0xff] }
  0xae   : > { %1898 = vmatpush1.bf16.msra.mxu0 %v2539_v4  ;;  %1984 = vmatpush1.bf16.msra.mxu1 %v2541_v5  ;;  %v465_v4 = vld [vmem:[#allocation5 + $0x620] sm:$0xff]  ;;  %v462_v5 = vld [vmem:[#allocation5 + $0x608] sm:$0xff] }
  0xaf   : > { %1910 = vmatprep.subr.bf16.mxu0 %v2548_v6  ;;  %1996 = vmatprep.subr.bf16.mxu1 %v2550_v7  ;;  %v466_v6 = vld [vmem:[#allocation5 + $0x628] sm:$0xff]  ;;  %v2603_v7 = vcombine.low %v453_v59, %v457_v60  ;;  %v2612_v9 = vcombine.high %v461_v3, %v465_v4 }
  0xb0   : > { %v2614_v11 = vcombine.high %v462_v5, %v466_v6  ;;  %v2613_v17 = vcombine.low %v462_v5, %v466_v6  ;;  %v271_v6 = vld [vmem:[#allocation5 + $0x10] sm:$0xff] }
  0xb1   : > { %1900 = vmatmul.mubr.bf16.vlgmr.msra.gmra.mrb[0].mxu0 %v3237_v10  ;;  %1986 = vmatmul.mubr.bf16.vlgmr.msra.gmra.mrb[0].mxu1 %v3237_v10 }
  0xb2   : > { %1911 = vmatpush1.bf16.msra.mxu0 %v2547_v13  ;;  %1997 = vmatpush1.bf16.msra.mxu1 %v2549_v14  ;;  %v473_v13 = vld [vmem:[#allocation5 + $0x660] sm:$0xff]  ;;  %v470_v14 = vld [vmem:[#allocation5 + $0x648] sm:$0xff] }
  0xb3   : > { %1912 = vmatprep.subr.bf16.mxu0 %v2556_v15  ;;  %1998 = vmatprep.subr.bf16.mxu1 %v2558_v16  ;;  %v474_v15 = vld [vmem:[#allocation5 + $0x668] sm:$0xff]  ;;  %v2611_v16 = vcombine.low %v461_v3, %v465_v4  ;;  %v2620_v18 = vcombine.high %v469_v12, %v473_v13 }
  0xb4   : > { %1942 = vmatprep.mubr.bf16.mxu0 %v3240_v19  ;;  %2028 = vmatprep.mubr.bf16.mxu1 %v3240_v19  ;;  %v2622_v20 = vcombine.high %v470_v14, %v474_v15  ;;  %v2621_v26 = vcombine.low %v470_v14, %v474_v15  ;;  %v279_v15 = vld [vmem:[#allocation5 + $0x50] sm:$0xff] }
  0xb6   : > { %1913 = vmatpush1.bf16.msra.mxu0 %v2555_v22  ;;  %1999 = vmatpush1.bf16.msra.mxu1 %v2557_v23  ;;  %v481_v22 = vld [vmem:[#allocation5 + $0x6a0] sm:$0xff]  ;;  %v478_v23 = vld [vmem:[#allocation5 + $0x688] sm:$0xff] }
  0xb7   : > { %1914 = vmatprep.subr.bf16.mxu0 %v2564_v24  ;;  %2000 = vmatprep.subr.bf16.mxu1 %v2566_v25  ;;  %v482_v24 = vld [vmem:[#allocation5 + $0x6a8] sm:$0xff]  ;;  %v2619_v25 = vcombine.low %v469_v12, %v473_v13  ;;  %v2628_v27 = vcombine.high %v477_v21, %v481_v22 }
  0xb8   : > { %v2630_v28 = vcombine.high %v478_v23, %v482_v24  ;;  %v2629_v34 = vcombine.low %v478_v23, %v482_v24 }
  0xba   : > { %1915 = vmatpush1.bf16.msra.mxu0 %v2563_v30  ;;  %2001 = vmatpush1.bf16.msra.mxu1 %v2565_v31  ;;  %v489_v30 = vld [vmem:[#allocation5 + $0x6e0] sm:$0xff]  ;;  %v486_v31 = vld [vmem:[#allocation5 + $0x6c8] sm:$0xff] }
  0xbb   : > { %1916 = vmatprep.subr.bf16.mxu0 %v2572_v32  ;;  %2002 = vmatprep.subr.bf16.mxu1 %v2574_v33  ;;  %v490_v32 = vld [vmem:[#allocation5 + $0x6e8] sm:$0xff]  ;;  %v2627_v33 = vcombine.low %v477_v21, %v481_v22  ;;  %v2636_v35 = vcombine.high %v485_v29, %v489_v30 }
  0xbc   : > { %v2638_v36 = vcombine.high %v486_v31, %v490_v32  ;;  %v2637_v42 = vcombine.low %v486_v31, %v490_v32 }
  0xbe   : > { %1917 = vmatpush1.bf16.msra.mxu0 %v2571_v38  ;;  %2003 = vmatpush1.bf16.msra.mxu1 %v2573_v39  ;;  %v497_v38 = vld [vmem:[#allocation5 + $0x720] sm:$0xff]  ;;  %v494_v39 = vld [vmem:[#allocation5 + $0x708] sm:$0xff] }
  0xbf   : > { %1918 = vmatprep.subr.bf16.mxu0 %v2580_v40  ;;  %2004 = vmatprep.subr.bf16.mxu1 %v2582_v41  ;;  %v498_v40 = vld [vmem:[#allocation5 + $0x728] sm:$0xff]  ;;  %v2635_v41 = vcombine.low %v485_v29, %v489_v30  ;;  %v2644_v43 = vcombine.high %v493_v37, %v497_v38 }
  0xc0   : > { %v2646_v44 = vcombine.high %v494_v39, %v498_v40  ;;  %v2645_v50 = vcombine.low %v494_v39, %v498_v40 }
  0xc2   : > { %1919 = vmatpush1.bf16.msra.mxu0 %v2579_v46  ;;  %2005 = vmatpush1.bf16.msra.mxu1 %v2581_v47  ;;  %v505_v46 = vld [vmem:[#allocation5 + $0x760] sm:$0xff]  ;;  %v502_v47 = vld [vmem:[#allocation5 + $0x748] sm:$0xff] }
  0xc3   : > { %1920 = vmatprep.subr.bf16.mxu0 %v2588_v48  ;;  %2006 = vmatprep.subr.bf16.mxu1 %v2590_v49  ;;  %v506_v48 = vld [vmem:[#allocation5 + $0x768] sm:$0xff]  ;;  %v2643_v49 = vcombine.low %v493_v37, %v497_v38  ;;  %v2652_v51 = vcombine.high %v501_v45, %v505_v46 }
  0xc4   : > { %v2654_v52 = vcombine.high %v502_v47, %v506_v48  ;;  %v2653_v59 = vcombine.low %v502_v47, %v506_v48  ;;  %v311_v48 = vld [vmem:[#allocation5 + $0x150] sm:$0xff] }
  0xc6   : > { %1921 = vmatpush1.bf16.msra.mxu0 %v2587_v54  ;;  %2007 = vmatpush1.bf16.msra.mxu1 %v2589_v55  ;;  %v513_v54 = vld [vmem:[#allocation5 + $0x7a0] sm:$0xff]  ;;  %v510_v55 = vld [vmem:[#allocation5 + $0x788] sm:$0xff] }
  0xc7   : > { %1922 = vmatprep.subr.bf16.mxu0 %v2596_v57  ;;  %2008 = vmatprep.subr.bf16.mxu1 %v2598_v58  ;;  %v514_v57 = vld [vmem:[#allocation5 + $0x7a8] sm:$0xff]  ;;  %v2651_v58 = vcombine.low %v501_v45, %v505_v46  ;;  %v2660_v60 = vcombine.high %v509_v53, %v513_v54 }
  0xc8   : > { %v2662_v61 = vcombine.high %v510_v55, %v514_v57  ;;  %v2661_v3 = vcombine.low %v510_v55, %v514_v57  ;;  %v319_v57 = vld [vmem:[#allocation5 + $0x190] sm:$0xff] }
  0xca   : > { %1923 = vmatpush1.bf16.msra.mxu0 %v2595_v63  ;;  %2009 = vmatpush1.bf16.msra.mxu1 %v2597_v0  ;;  %v521_v63 = vld [vmem:[#allocation5 + $0x7e0] sm:$0xff]  ;;  %v518_v0 = vld [vmem:[#allocation5 + $0x7c8] sm:$0xff] }
  0xcb   : > { %1924 = vmatprep.subr.bf16.mxu0 %v2604_v1  ;;  %2010 = vmatprep.subr.bf16.mxu1 %v2606_v2  ;;  %v522_v1 = vld [vmem:[#allocation5 + $0x7e8] sm:$0xff]  ;;  %v2659_v2 = vcombine.low %v509_v53, %v513_v54  ;;  %v2668_v4 = vcombine.high %v517_v62, %v521_v63 }
  0xcc   : > { %v2670_v5 = vcombine.high %v518_v0, %v522_v1  ;;  %v2669_v12 = vcombine.low %v518_v0, %v522_v1  ;;  %v327_v1 = vld [vmem:[#allocation5 + $0x1d0] sm:$0xff] }
  0xce   : > { %1925 = vmatpush1.bf16.msra.mxu0 %v2603_v7  ;;  %2011 = vmatpush1.bf16.msra.mxu1 %v2605_v8  ;;  %v275_v7 = vld [vmem:[#allocation5 + $0x30] sm:$0xff]  ;;  %v272_v8 = vld [vmem:[#allocation5 + $0x18] sm:$0xff] }
  0xcf   : > { %1926 = vmatprep.subr.bf16.mxu0 %v2612_v9  ;;  %2012 = vmatprep.subr.bf16.mxu1 %v2614_v11  ;;  %v276_v9 = vld [vmem:[#allocation5 + $0x38] sm:$0xff]  ;;  %v2667_v11 = vcombine.low %v517_v62, %v521_v63  ;;  %v2424_v13 = vcombine.high %v271_v6, %v275_v7  ;;  %v2423_v21 = vcombine.low %v271_v6, %v275_v7 }
  0xd0   : > { %v2426_v14 = vcombine.high %v272_v8, %v276_v9  ;;  %v2425_v22 = vcombine.low %v272_v8, %v276_v9  ;;  %v335_v9 = vld [vmem:[#allocation5 + $0x210] sm:$0xff] }
  0xd2   : > { %1927 = vmatpush1.bf16.msra.mxu0 %v2611_v16  ;;  %2013 = vmatpush1.bf16.msra.mxu1 %v2613_v17  ;;  %v283_v16 = vld [vmem:[#allocation5 + $0x70] sm:$0xff]  ;;  %v3247_v17 = vld [vmem:[%s3221_s28 + $0x8] ss:$16 sps:$4 sm:$0xff]  }
  0xd3   : > { %1928 = vmatprep.subr.bf16.mxu0 %v2620_v18  ;;  %2014 = vmatprep.subr.bf16.mxu1 %v2622_v20  ;;  %v280_v18 = vld [vmem:[#allocation5 + $0x58] sm:$0xff]  ;;  %v2432_v23 = vcombine.high %v279_v15, %v283_v16  ;;  %v2431_v29 = vcombine.low %v279_v15, %v283_v16 }
  0xd4   : > { %v284_v20 = vld [vmem:[#allocation5 + $0x78] sm:$0xff] }
  0xd5   : > { %v2434_v24 = vcombine.high %v280_v18, %v284_v20  ;;  %v2433_v30 = vcombine.low %v280_v18, %v284_v20  ;;  %v343_v20 = vld [vmem:[#allocation5 + $0x250] sm:$0xff] }
  0xd6   : > { %1929 = vmatpush1.bf16.msra.mxu0 %v2619_v25  ;;  %2015 = vmatpush1.bf16.msra.mxu1 %v2621_v26  ;;  %v287_v25 = vld [vmem:[#allocation5 + $0x90] sm:$0xff] }
  0xd7   : > { %1930 = vmatprep.subr.bf16.mxu0 %v2628_v27  ;;  %2016 = vmatprep.subr.bf16.mxu1 %v2630_v28  ;;  %v291_v26 = vld [vmem:[#allocation5 + $0xb0] sm:$0xff]  ;;  %v288_v27 = vld [vmem:[#allocation5 + $0x98] sm:$0xff] }
  0xd8   : > { %v292_v28 = vld [vmem:[#allocation5 + $0xb8] sm:$0xff]  ;;  %v2440_v31 = vcombine.high %v287_v25, %v291_v26  ;;  %v2439_v37 = vcombine.low %v287_v25, %v291_v26 }
  0xd9   : > { %v2442_v32 = vcombine.high %v288_v27, %v292_v28  ;;  %v2441_v38 = vcombine.low %v288_v27, %v292_v28  ;;  %v351_v28 = vld [vmem:[#allocation5 + $0x290] sm:$0xff] }
  0xda   : > { %1931 = vmatpush1.bf16.msra.mxu0 %v2627_v33  ;;  %2017 = vmatpush1.bf16.msra.mxu1 %v2629_v34  ;;  %v295_v33 = vld [vmem:[#allocation5 + $0xd0] sm:$0xff] }
  0xdb   : > { %1932 = vmatprep.subr.bf16.mxu0 %v2636_v35  ;;  %2018 = vmatprep.subr.bf16.mxu1 %v2638_v36  ;;  %v299_v34 = vld [vmem:[#allocation5 + $0xf0] sm:$0xff]  ;;  %v296_v35 = vld [vmem:[#allocation5 + $0xd8] sm:$0xff] }
  0xdc   : > { %v300_v36 = vld [vmem:[#allocation5 + $0xf8] sm:$0xff]  ;;  %v2448_v39 = vcombine.high %v295_v33, %v299_v34  ;;  %v2447_v45 = vcombine.low %v295_v33, %v299_v34 }
  0xdd   : > { %v2450_v40 = vcombine.high %v296_v35, %v300_v36  ;;  %v2449_v46 = vcombine.low %v296_v35, %v300_v36  ;;  %v359_v36 = vld [vmem:[#allocation5 + $0x2d0] sm:$0xff] }
  0xde   : > { %1933 = vmatpush1.bf16.msra.mxu0 %v2635_v41  ;;  %2019 = vmatpush1.bf16.msra.mxu1 %v2637_v42  ;;  %v303_v41 = vld [vmem:[#allocation5 + $0x110] sm:$0xff] }
  0xdf   : > { %1934 = vmatprep.subr.bf16.mxu0 %v2644_v43  ;;  %2020 = vmatprep.subr.bf16.mxu1 %v2646_v44  ;;  %v307_v42 = vld [vmem:[#allocation5 + $0x130] sm:$0xff]  ;;  %v304_v43 = vld [vmem:[#allocation5 + $0x118] sm:$0xff] }
  0xe0   : > { %v308_v44 = vld [vmem:[#allocation5 + $0x138] sm:$0xff]  ;;  %v2456_v47 = vcombine.high %v303_v41, %v307_v42 }
  0xe1   : > { %v2457_v53 = vcombine.low %v304_v43, %v308_v44 }
  0xe2   : > { %1935 = vmatpush1.bf16.msra.mxu0 %v2643_v49  ;;  %2021 = vmatpush1.bf16.msra.mxu1 %v2645_v50  ;;  %v315_v49 = vld [vmem:[#allocation5 + $0x170] sm:$0xff]  ;;  %v312_v50 = vld [vmem:[#allocation5 + $0x158] sm:$0xff] }
  0xe3   : > { %1936 = vmatprep.subr.bf16.mxu0 %v2652_v51  ;;  %2022 = vmatprep.subr.bf16.mxu1 %v2654_v52  ;;  %v316_v51 = vld [vmem:[#allocation5 + $0x178] sm:$0xff]  ;;  %v2455_v52 = vcombine.low %v303_v41, %v307_v42  ;;  %v2464_v54 = vcombine.high %v311_v48, %v315_v49 }
  0xe4   : > { %v2466_v55 = vcombine.high %v312_v50, %v316_v51  ;;  %v2465_v62 = vcombine.low %v312_v50, %v316_v51  ;;  %v375_v51 = vld [vmem:[#allocation5 + $0x350] sm:$0xff] }
  0xe6   : > { %1937 = vmatpush1.bf16.msra.mxu0 %v2651_v58  ;;  %2023 = vmatpush1.bf16.msra.mxu1 %v2653_v59  ;;  %v323_v58 = vld [vmem:[#allocation5 + $0x1b0] sm:$0xff]  ;;  %v320_v59 = vld [vmem:[#allocation5 + $0x198] sm:$0xff] }
  0xe7   : > { %1938 = vmatprep.subr.bf16.mxu0 %v2660_v60  ;;  %2024 = vmatprep.subr.bf16.mxu1 %v2662_v61  ;;  %v324_v60 = vld [vmem:[#allocation5 + $0x1b8] sm:$0xff]  ;;  %v2463_v61 = vcombine.low %v311_v48, %v315_v49  ;;  %v2472_v63 = vcombine.high %v319_v57, %v323_v58 }
  0xe8   : > { %v2474_v0 = vcombine.high %v320_v59, %v324_v60  ;;  %v2473_v6 = vcombine.low %v320_v59, %v324_v60  ;;  %v383_v60 = vld [vmem:[#allocation5 + $0x390] sm:$0xff] }
  0xea   : > { %1939 = vmatpush1.bf16.msra.mxu0 %v2659_v2  ;;  %2025 = vmatpush1.bf16.msra.mxu1 %v2661_v3  ;;  %v331_v2 = vld [vmem:[#allocation5 + $0x1f0] sm:$0xff]  ;;  %v328_v3 = vld [vmem:[#allocation5 + $0x1d8] sm:$0xff] }
  0xeb   : > { %1940 = vmatprep.subr.bf16.mxu0 %v2668_v4  ;;  %2026 = vmatprep.subr.bf16.mxu1 %v2670_v5  ;;  %v332_v4 = vld [vmem:[#allocation5 + $0x1f8] sm:$0xff]  ;;  %v2471_v5 = vcombine.low %v319_v57, %v323_v58  ;;  %v2480_v7 = vcombine.high %v327_v1, %v331_v2 }
  0xec   : > { %v2482_v8 = vcombine.high %v328_v3, %v332_v4  ;;  %v2481_v15 = vcombine.low %v328_v3, %v332_v4  ;;  %v391_v4 = vld [vmem:[#allocation5 + $0x3d0] sm:$0xff] }
  0xee   : > { %1941 = vmatpush1.bf16.msra.mxu0 %v2667_v11  ;;  %2027 = vmatpush1.bf16.msra.mxu1 %v2669_v12  ;;  %v339_v11 = vld [vmem:[#allocation5 + $0x230] sm:$0xff]  ;;  %v336_v12 = vld [vmem:[#allocation5 + $0x218] sm:$0xff] }
  0xef   : > { %2039 = vmatprep.subr.bf16.mxu0 %v2424_v13  ;;  %2125 = vmatprep.subr.bf16.mxu1 %v2426_v14  ;;  %v340_v13 = vld [vmem:[#allocation5 + $0x238] sm:$0xff]  ;;  %v2479_v14 = vcombine.low %v327_v1, %v331_v2  ;;  %v2488_v16 = vcombine.high %v335_v9, %v339_v11 }
  0xf0   : > { %v2490_v18 = vcombine.high %v336_v12, %v340_v13  ;;  %v2489_v25 = vcombine.low %v336_v12, %v340_v13  ;;  %v399_v13 = vld [vmem:[#allocation5 + $0x410] sm:$0xff] }
  0xf1   : > { %1943 = vmatmul.mubr.bf16.vlgmr.msra.gmra.mrb[0].mxu0 %v3247_v17  ;;  %2029 = vmatmul.mubr.bf16.vlgmr.msra.gmra.mrb[0].mxu1 %v3247_v17 }
  0xf2   : > { %2040 = vmatpush1.bf16.msra.mxu0 %v2423_v21  ;;  %2126 = vmatpush1.bf16.msra.mxu1 %v2425_v22  ;;  %v347_v21 = vld [vmem:[#allocation5 + $0x270] sm:$0xff]  ;;  %v344_v22 = vld [vmem:[#allocation5 + $0x258] sm:$0xff] }
  0xf3   : > { %2041 = vmatprep.subr.bf16.mxu0 %v2432_v23  ;;  %2127 = vmatprep.subr.bf16.mxu1 %v2434_v24  ;;  %v348_v23 = vld [vmem:[#allocation5 + $0x278] sm:$0xff]  ;;  %v2487_v24 = vcombine.low %v335_v9, %v339_v11  ;;  %v2496_v26 = vcombine.high %v343_v20, %v347_v21 }
  0xf4   : > { %2071 = vmatprep.mubr.bf16.mxu0 %v3232_v56  ;;  %2157 = vmatprep.mubr.bf16.mxu1 %v3232_v56  ;;  %v2458_v56 = vcombine.high %v304_v43, %v308_v44  ;;  %v2498_v27 = vcombine.high %v344_v22, %v348_v23  ;;  %v2497_v33 = vcombine.low %v344_v22, %v348_v23  ;;  %v367_v44 = vld [vmem:[#allocation5 + $0x310] sm:$0xff] }
  0xf5   : > { %v407_v23 = vld [vmem:[#allocation5 + $0x450] sm:$0xff] }
  0xf6   : > { %2042 = vmatpush1.bf16.msra.mxu0 %v2431_v29  ;;  %2128 = vmatpush1.bf16.msra.mxu1 %v2433_v30  ;;  %v355_v29 = vld [vmem:[#allocation5 + $0x2b0] sm:$0xff]  ;;  %v352_v30 = vld [vmem:[#allocation5 + $0x298] sm:$0xff] }
  0xf7   : > { %2043 = vmatprep.subr.bf16.mxu0 %v2440_v31  ;;  %2129 = vmatprep.subr.bf16.mxu1 %v2442_v32  ;;  %v356_v31 = vld [vmem:[#allocation5 + $0x2b8] sm:$0xff]  ;;  %v2495_v32 = vcombine.low %v343_v20, %v347_v21  ;;  %v2504_v34 = vcombine.high %v351_v28, %v355_v29 }
  0xf8   : > { %v2506_v35 = vcombine.high %v352_v30, %v356_v31  ;;  %v2505_v41 = vcombine.low %v352_v30, %v356_v31  ;;  %v415_v31 = vld [vmem:[#allocation5 + $0x490] sm:$0xff] }
  0xfa   : > { %2044 = vmatpush1.bf16.msra.mxu0 %v2439_v37  ;;  %2130 = vmatpush1.bf16.msra.mxu1 %v2441_v38  ;;  %v363_v37 = vld [vmem:[#allocation5 + $0x2f0] sm:$0xff]  ;;  %v360_v38 = vld [vmem:[#allocation5 + $0x2d8] sm:$0xff] }
  0xfb   : > { %2045 = vmatprep.subr.bf16.mxu0 %v2448_v39  ;;  %2131 = vmatprep.subr.bf16.mxu1 %v2450_v40  ;;  %v364_v39 = vld [vmem:[#allocation5 + $0x2f8] sm:$0xff]  ;;  %v2503_v40 = vcombine.low %v351_v28, %v355_v29  ;;  %v2512_v42 = vcombine.high %v359_v36, %v363_v37 }
  0xfc   : > { %v2514_v43 = vcombine.high %v360_v38, %v364_v39  ;;  %v2513_v48 = vcombine.low %v360_v38, %v364_v39  ;;  %v423_v39 = vld [vmem:[#allocation5 + $0x4d0] sm:$0xff] }
  0xfe   : > { %2046 = vmatpush1.bf16.msra.mxu0 %v2447_v45  ;;  %2132 = vmatpush1.bf16.msra.mxu1 %v2449_v46  ;;  %v371_v45 = vld [vmem:[#allocation5 + $0x330] sm:$0xff]  ;;  %v368_v46 = vld [vmem:[#allocation5 + $0x318] sm:$0xff] }
  0xff   : > { %2047 = vmatprep.subr.bf16.mxu0 %v2456_v47  ;;  %2133 = vmatprep.subr.bf16.mxu1 %v2458_v56  ;;  %v372_v47 = vld [vmem:[#allocation5 + $0x338] sm:$0xff]  ;;  %v2511_v56 = vcombine.low %v359_v36, %v363_v37  ;;  %v2520_v49 = vcombine.high %v367_v44, %v371_v45 }
 0x100   : > { %v2522_v50 = vcombine.high %v368_v46, %v372_v47  ;;  %v2521_v57 = vcombine.low %v368_v46, %v372_v47  ;;  %v431_v46 = vld [vmem:[#allocation5 + $0x510] sm:$0xff] }
 0x101   : > { %v435_v47 = vld [vmem:[#allocation5 + $0x530] sm:$0xff] }
 0x102   : > { %2048 = vmatpush1.bf16.msra.mxu0 %v2455_v52  ;;  %2134 = vmatpush1.bf16.msra.mxu1 %v2457_v53  ;;  %v379_v52 = vld [vmem:[#allocation5 + $0x370] sm:$0xff]  ;;  %v376_v53 = vld [vmem:[#allocation5 + $0x358] sm:$0xff] }
 0x103   : > { %2049 = vmatprep.subr.bf16.mxu0 %v2464_v54  ;;  %2135 = vmatprep.subr.bf16.mxu1 %v2466_v55  ;;  %v380_v54 = vld [vmem:[#allocation5 + $0x378] sm:$0xff]  ;;  %v2519_v55 = vcombine.low %v367_v44, %v371_v45  ;;  %v2528_v58 = vcombine.high %v375_v51, %v379_v52 }
 0x104   : > { %v2530_v59 = vcombine.high %v376_v53, %v380_v54  ;;  %v2529_v1 = vcombine.low %v376_v53, %v380_v54  ;;  %v443_v53 = vld [vmem:[#allocation5 + $0x570] sm:$0xff]  ;;  %v440_v54 = vld [vmem:[#allocation5 + $0x558] sm:$0xff] }
 0x106   : > { %2050 = vmatpush1.bf16.msra.mxu0 %v2463_v61  ;;  %2136 = vmatpush1.bf16.msra.mxu1 %v2465_v62  ;;  %v387_v61 = vld [vmem:[#allocation5 + $0x3b0] sm:$0xff]  ;;  %v384_v62 = vld [vmem:[#allocation5 + $0x398] sm:$0xff] }
 0x107   : > { %2051 = vmatprep.subr.bf16.mxu0 %v2472_v63  ;;  %2137 = vmatprep.subr.bf16.mxu1 %v2474_v0  ;;  %v388_v63 = vld [vmem:[#allocation5 + $0x3b8] sm:$0xff]  ;;  %v2527_v0 = vcombine.low %v375_v51, %v379_v52  ;;  %v2536_v2 = vcombine.high %v383_v60, %v387_v61  ;;  %v2584_v51 = vcombine.high %v431_v46, %v435_v47  ;;  %v439_v52 = vld [vmem:[#allocation5 + $0x550] sm:$0xff] }
 0x108   : > { %v2538_v3 = vcombine.high %v384_v62, %v388_v63  ;;  %v2537_v9 = vcombine.low %v384_v62, %v388_v63  ;;  %v451_v62 = vld [vmem:[#allocation5 + $0x5b0] sm:$0xff]  ;;  %v448_v63 = vld [vmem:[#allocation5 + $0x598] sm:$0xff] }
 0x10a   : > { %2052 = vmatpush1.bf16.msra.mxu0 %v2471_v5  ;;  %2138 = vmatpush1.bf16.msra.mxu1 %v2473_v6  ;;  %v395_v5 = vld [vmem:[#allocation5 + $0x3f0] sm:$0xff]  ;;  %v392_v6 = vld [vmem:[#allocation5 + $0x3d8] sm:$0xff] }
 0x10b   : > { %2053 = vmatprep.subr.bf16.mxu0 %v2480_v7  ;;  %2139 = vmatprep.subr.bf16.mxu1 %v2482_v8  ;;  %v396_v7 = vld [vmem:[#allocation5 + $0x3f8] sm:$0xff]  ;;  %v2535_v8 = vcombine.low %v383_v60, %v387_v61  ;;  %v2544_v11 = vcombine.high %v391_v4, %v395_v5  ;;  %v447_v61 = vld [vmem:[#allocation5 + $0x590] sm:$0xff] }
 0x10c   : > { %v2546_v12 = vcombine.high %v392_v6, %v396_v7  ;;  %v2545_v20 = vcombine.low %v392_v6, %v396_v7  ;;  %v459_v6 = vld [vmem:[#allocation5 + $0x5f0] sm:$0xff]  ;;  %v456_v7 = vld [vmem:[#allocation5 + $0x5d8] sm:$0xff] }
 0x10e   : > { %2054 = vmatpush1.bf16.msra.mxu0 %v2479_v14  ;;  %2140 = vmatpush1.bf16.msra.mxu1 %v2481_v15  ;;  %v403_v14 = vld [vmem:[#allocation5 + $0x430] sm:$0xff]  ;;  %v400_v15 = vld [vmem:[#allocation5 + $0x418] sm:$0xff] }
 0x10f   : > { %2055 = vmatprep.subr.bf16.mxu0 %v2488_v16  ;;  %2141 = vmatprep.subr.bf16.mxu1 %v2490_v18  ;;  %v404_v16 = vld [vmem:[#allocation5 + $0x438] sm:$0xff]  ;;  %v2543_v18 = vcombine.low %v391_v4, %v395_v5  ;;  %v2552_v21 = vcombine.high %v399_v13, %v403_v14  ;;  %v455_v5 = vld [vmem:[#allocation5 + $0x5d0] sm:$0xff] }
 0x110   : > { %v2554_v22 = vcombine.high %v400_v15, %v404_v16  ;;  %v2553_v28 = vcombine.low %v400_v15, %v404_v16  ;;  %v467_v15 = vld [vmem:[#allocation5 + $0x630] sm:$0xff]  ;;  %v464_v16 = vld [vmem:[#allocation5 + $0x618] sm:$0xff] }
 0x112   : > { %2056 = vmatpush1.bf16.msra.mxu0 %v2487_v24  ;;  %2142 = vmatpush1.bf16.msra.mxu1 %v2489_v25  ;;  %v411_v24 = vld [vmem:[#allocation5 + $0x470] sm:$0xff]  ;;  %v408_v25 = vld [vmem:[#allocation5 + $0x458] sm:$0xff] }
 0x113   : > { %2057 = vmatprep.subr.bf16.mxu0 %v2496_v26  ;;  %2143 = vmatprep.subr.bf16.mxu1 %v2498_v27  ;;  %v412_v26 = vld [vmem:[#allocation5 + $0x478] sm:$0xff]  ;;  %v2551_v27 = vcombine.low %v399_v13, %v403_v14  ;;  %v2560_v29 = vcombine.high %v407_v23, %v411_v24  ;;  %v463_v14 = vld [vmem:[#allocation5 + $0x610] sm:$0xff] }
 0x114   : > { %v2562_v30 = vcombine.high %v408_v25, %v412_v26  ;;  %v2561_v36 = vcombine.low %v408_v25, %v412_v26  ;;  %v475_v25 = vld [vmem:[#allocation5 + $0x670] sm:$0xff]  ;;  %v472_v26 = vld [vmem:[#allocation5 + $0x658] sm:$0xff] }
 0x116   : > { %2058 = vmatpush1.bf16.msra.mxu0 %v2495_v32  ;;  %2144 = vmatpush1.bf16.msra.mxu1 %v2497_v33  ;;  %v419_v32 = vld [vmem:[#allocation5 + $0x4b0] sm:$0xff]  ;;  %v416_v33 = vld [vmem:[#allocation5 + $0x498] sm:$0xff] }
 0x117   : > { %2059 = vmatprep.subr.bf16.mxu0 %v2504_v34  ;;  %2145 = vmatprep.subr.bf16.mxu1 %v2506_v35  ;;  %v420_v34 = vld [vmem:[#allocation5 + $0x4b8] sm:$0xff]  ;;  %v2559_v35 = vcombine.low %v407_v23, %v411_v24  ;;  %v2568_v37 = vcombine.high %v415_v31, %v419_v32  ;;  %v471_v24 = vld [vmem:[#allocation5 + $0x650] sm:$0xff] }
 0x118   : > { %v2570_v38 = vcombine.high %v416_v33, %v420_v34 }
 0x11a   : > { %2060 = vmatpush1.bf16.msra.mxu0 %v2503_v40  ;;  %2146 = vmatpush1.bf16.msra.mxu1 %v2505_v41  ;;  %v427_v40 = vld [vmem:[#allocation5 + $0x4f0] sm:$0xff]  ;;  %v424_v41 = vld [vmem:[#allocation5 + $0x4d8] sm:$0xff] }
 0x11b   : > { %2061 = vmatprep.subr.bf16.mxu0 %v2512_v42  ;;  %2147 = vmatprep.subr.bf16.mxu1 %v2514_v43  ;;  %v428_v42 = vld [vmem:[#allocation5 + $0x4f8] sm:$0xff]  ;;  %v2567_v43 = vcombine.low %v415_v31, %v419_v32  ;;  %v2576_v44 = vcombine.high %v423_v39, %v427_v40  ;;  %v479_v32 = vld [vmem:[#allocation5 + $0x690] sm:$0xff] }
 0x11c   : > { %v2578_v45 = vcombine.high %v424_v41, %v428_v42 }
 0x11e   : > { %2062 = vmatpush1.bf16.msra.mxu0 %v2511_v56  ;;  %2148 = vmatpush1.bf16.msra.mxu1 %v2513_v48  ;;  %v432_v56 = vld [vmem:[#allocation5 + $0x518] sm:$0xff] }
 0x11f   : > { %2063 = vmatprep.subr.bf16.mxu0 %v2520_v49  ;;  %2149 = vmatprep.subr.bf16.mxu1 %v2522_v50  ;;  %v436_v48 = vld [vmem:[#allocation5 + $0x538] sm:$0xff]  ;;  %v2575_v49 = vcombine.low %v423_v39, %v427_v40  ;;  %v2577_v50 = vcombine.low %v424_v41, %v428_v42  ;;  %v487_v40 = vld [vmem:[#allocation5 + $0x6d0] sm:$0xff] }
 0x120   : > { %v491_v41 = vld [vmem:[#allocation5 + $0x6f0] sm:$0xff]  ;;  %v488_v42 = vld [vmem:[#allocation5 + $0x6d8] sm:$0xff] }
 0x122   : > { %2064 = vmatpush1.bf16.msra.mxu0 %v2519_v55  ;;  %2150 = vmatpush1.bf16.msra.mxu1 %v2521_v57  ;;  %v444_v55 = vld [vmem:[#allocation5 + $0x578] sm:$0xff]  ;;  %v2583_v57 = vcombine.low %v431_v46, %v435_v47  ;;  %v495_v47 = vld [vmem:[#allocation5 + $0x710] sm:$0xff] }
 0x123   : > { %2065 = vmatprep.subr.bf16.mxu0 %v2528_v58  ;;  %2151 = vmatprep.subr.bf16.mxu1 %v2530_v59  ;;  %v2585_v58 = vcombine.low %v432_v56, %v436_v48  ;;  %v2592_v59 = vcombine.high %v439_v52, %v443_v53  ;;  %v2594_v60 = vcombine.high %v440_v54, %v444_v55 }
 0x126   : > { %2066 = vmatpush1.bf16.msra.mxu0 %v2527_v0  ;;  %2152 = vmatpush1.bf16.msra.mxu1 %v2529_v1  ;;  %v452_v0 = vld [vmem:[#allocation5 + $0x5b8] sm:$0xff]  ;;  %v2591_v1 = vcombine.low %v439_v52, %v443_v53  ;;  %v503_v53 = vld [vmem:[#allocation5 + $0x750] sm:$0xff] }
 0x127   : > { %2067 = vmatprep.subr.bf16.mxu0 %v2536_v2  ;;  %2153 = vmatprep.subr.bf16.mxu1 %v2538_v3  ;;  %v2593_v2 = vcombine.low %v440_v54, %v444_v55  ;;  %v2600_v3 = vcombine.high %v447_v61, %v451_v62  ;;  %v2602_v4 = vcombine.high %v448_v63, %v452_v0  ;;  %v507_v54 = vld [vmem:[#allocation5 + $0x770] sm:$0xff]  ;;  %v504_v55 = vld [vmem:[#allocation5 + $0x758] sm:$0xff] }
 0x12a   : > { %2068 = vmatpush1.bf16.msra.mxu0 %v2535_v8  ;;  %2154 = vmatpush1.bf16.msra.mxu1 %v2537_v9  ;;  %v460_v8 = vld [vmem:[#allocation5 + $0x5f8] sm:$0xff]  ;;  %v2599_v9 = vcombine.low %v447_v61, %v451_v62  ;;  %v511_v62 = vld [vmem:[#allocation5 + $0x790] sm:$0xff] }
 0x12b   : > { %2069 = vmatprep.subr.bf16.mxu0 %v2544_v11  ;;  %2155 = vmatprep.subr.bf16.mxu1 %v2546_v12  ;;  %v2601_v11 = vcombine.low %v448_v63, %v452_v0  ;;  %v2608_v12 = vcombine.high %v455_v5, %v459_v6  ;;  %v2610_v13 = vcombine.high %v456_v7, %v460_v8  ;;  %v515_v63 = vld [vmem:[#allocation5 + $0x7b0] sm:$0xff]  ;;  %v512_v0 = vld [vmem:[#allocation5 + $0x798] sm:$0xff] }
 0x12e   : > { %2070 = vmatpush1.bf16.msra.mxu0 %v2543_v18  ;;  %2156 = vmatpush1.bf16.msra.mxu1 %v2545_v20  ;;  %v468_v18 = vld [vmem:[#allocation5 + $0x638] sm:$0xff]  ;;  %v2607_v20 = vcombine.low %v455_v5, %v459_v6  ;;  %v519_v6 = vld [vmem:[#allocation5 + $0x7d0] sm:$0xff] }
 0x12f   : > { %2082 = vmatprep.subr.bf16.mxu0 %v2552_v21  ;;  %2168 = vmatprep.subr.bf16.mxu1 %v2554_v22  ;;  %v2609_v21 = vcombine.low %v456_v7, %v460_v8  ;;  %v2616_v22 = vcombine.high %v463_v14, %v467_v15  ;;  %v2618_v23 = vcombine.high %v464_v16, %v468_v18  ;;  %v523_v7 = vld [vmem:[#allocation5 + $0x7f0] sm:$0xff]  ;;  %v520_v8 = vld [vmem:[#allocation5 + $0x7d8] sm:$0xff] }
 0x131   : > { %2072 = vmatmul.mubr.bf16.vlgmr.msra.gmra.mrb[4].mxu0 %v3237_v10  ;;  %2158 = vmatmul.mubr.bf16.vlgmr.msra.gmra.mrb[4].mxu1 %v3237_v10  ;;  %v2569_v10 = vcombine.low %v416_v33, %v420_v34  ;;  %v483_v33 = vld [vmem:[#allocation5 + $0x6b0] sm:$0xff]  ;;  %v480_v34 = vld [vmem:[#allocation5 + $0x698] sm:$0xff] }
 0x132   : > { %2083 = vmatpush1.bf16.msra.mxu0 %v2551_v27  ;;  %2169 = vmatpush1.bf16.msra.mxu1 %v2553_v28  ;;  %v476_v27 = vld [vmem:[#allocation5 + $0x678] sm:$0xff]  ;;  %v2615_v28 = vcombine.low %v463_v14, %v467_v15  ;;  %v2671_v15 = vcombine.low %v519_v6, %v523_v7 }
 0x133   : > { %2084 = vmatprep.subr.bf16.mxu0 %v2560_v29  ;;  %2170 = vmatprep.subr.bf16.mxu1 %v2562_v30  ;;  %v2617_v29 = vcombine.low %v464_v16, %v468_v18  ;;  %v2624_v30 = vcombine.high %v471_v24, %v475_v25  ;;  %v2626_v31 = vcombine.high %v472_v26, %v476_v27  ;;  %v527_v18 = vlaneseq }
 0x134   : > { %2114 = vmatprep.mubr.bf16.mxu0 %v3240_v19  ;;  %2200 = vmatprep.mubr.bf16.mxu1 %v3240_v19  ;;  %v2586_v19 = vcombine.high %v432_v56, %v436_v48  ;;  %v499_v56 = vld [vmem:[#allocation5 + $0x730] sm:$0xff]  ;;  %v496_v48 = vld [vmem:[#allocation5 + $0x718] sm:$0xff] }
 0x136   : > { %2085 = vmatpush1.bf16.msra.mxu0 %v2559_v35  ;;  %2171 = vmatpush1.bf16.msra.mxu1 %v2561_v36  ;;  %v484_v35 = vld [vmem:[#allocation5 + $0x6b8] sm:$0xff]  ;;  %v2623_v36 = vcombine.low %v471_v24, %v475_v25 }
 0x137   : > { %2086 = vmatprep.subr.bf16.mxu0 %v2568_v37  ;;  %2172 = vmatprep.subr.bf16.mxu1 %v2570_v38  ;;  %v2625_v37 = vcombine.low %v472_v26, %v476_v27  ;;  %v2632_v38 = vcombine.high %v479_v32, %v483_v33  ;;  %v2634_v39 = vcombine.high %v480_v34, %v484_v35 }
 0x13a   : > { %2087 = vmatpush1.bf16.msra.mxu0 %v2567_v43  ;;  %2173 = vmatpush1.bf16.msra.mxu1 %v2569_v10  ;;  %v492_v43 = vld [vmem:[#allocation5 + $0x6f8] sm:$0xff]  ;;  %v2631_v10 = vcombine.low %v479_v32, %v483_v33 }
 0x13b   : > { %2088 = vmatprep.subr.bf16.mxu0 %v2576_v44  ;;  %2174 = vmatprep.subr.bf16.mxu1 %v2578_v45  ;;  %v2633_v44 = vcombine.low %v480_v34, %v484_v35  ;;  %v2640_v45 = vcombine.high %v487_v40, %v491_v41  ;;  %v2642_v46 = vcombine.high %v488_v42, %v492_v43 }
 0x13e   : > { %2089 = vmatpush1.bf16.msra.mxu0 %v2575_v49  ;;  %2175 = vmatpush1.bf16.msra.mxu1 %v2577_v50  ;;  %v500_v49 = vld [vmem:[#allocation5 + $0x738] sm:$0xff]  ;;  %v2639_v50 = vcombine.low %v487_v40, %v491_v41 }
 0x13f   : > { %2090 = vmatprep.subr.bf16.mxu0 %v2584_v51  ;;  %2176 = vmatprep.subr.bf16.mxu1 %v2586_v19  ;;  %v2641_v51 = vcombine.low %v488_v42, %v492_v43  ;;  %v2648_v19 = vcombine.high %v495_v47, %v499_v56  ;;  %v2650_v52 = vcombine.high %v496_v48, %v500_v49 }
 0x142   : > { %2091 = vmatpush1.bf16.msra.mxu0 %v2583_v57  ;;  %2177 = vmatpush1.bf16.msra.mxu1 %v2585_v58  ;;  %v508_v57 = vld [vmem:[#allocation5 + $0x778] sm:$0xff]  ;;  %v2647_v58 = vcombine.low %v495_v47, %v499_v56 }
 0x143   : > { %2092 = vmatprep.subr.bf16.mxu0 %v2592_v59  ;;  %2178 = vmatprep.subr.bf16.mxu1 %v2594_v60  ;;  %v2649_v59 = vcombine.low %v496_v48, %v500_v49  ;;  %v2656_v60 = vcombine.high %v503_v53, %v507_v54  ;;  %v2658_v61 = vcombine.high %v504_v55, %v508_v57 }
 0x146   : > { %2093 = vmatpush1.bf16.msra.mxu0 %v2591_v1  ;;  %2179 = vmatpush1.bf16.msra.mxu1 %v2593_v2  ;;  %v516_v1 = vld [vmem:[#allocation5 + $0x7b8] sm:$0xff]  ;;  %v2655_v2 = vcombine.low %v503_v53, %v507_v54 }
 0x147   : > { %2094 = vmatprep.subr.bf16.mxu0 %v2600_v3  ;;  %2180 = vmatprep.subr.bf16.mxu1 %v2602_v4  ;;  %v2657_v3 = vcombine.low %v504_v55, %v508_v57  ;;  %v2664_v4 = vcombine.high %v511_v62, %v515_v63  ;;  %v2666_v5 = vcombine.high %v512_v0, %v516_v1 }
 0x14a   : > { %2095 = vmatpush1.bf16.msra.mxu0 %v2599_v9  ;;  %2181 = vmatpush1.bf16.msra.mxu1 %v2601_v11  ;;  %v524_v9 = vld [vmem:[#allocation5 + $0x7f8] sm:$0xff]  ;;  %v2663_v11 = vcombine.low %v511_v62, %v515_v63 }
 0x14b   : > { %2096 = vmatprep.subr.bf16.mxu0 %v2608_v12  ;;  %2182 = vmatprep.subr.bf16.mxu1 %v2610_v13  ;;  %v2665_v12 = vcombine.low %v512_v0, %v516_v1  ;;  %v2672_v13 = vcombine.high %v519_v6, %v523_v7  ;;  %v2674_v14 = vcombine.high %v520_v8, %v524_v9 }
 0x14c   : > { %v2673_v16 = vcombine.low %v520_v8, %v524_v9 }
 0x14e   : > { %2097 = vmatpush1.bf16.msra.mxu0 %v2607_v20  ;;  %2183 = vmatpush1.bf16.msra.mxu1 %v2609_v21  ;;  %v528_v20 = vshrl.u32 %v527_v18, 7 }
 0x14f   : > { %2098 = vmatprep.subr.bf16.mxu0 %v2616_v22  ;;  %2184 = vmatprep.subr.bf16.mxu1 %v2618_v23  ;;  %v525_v22 = vld [vmem:[#allocation7] sm:$0xff] }
 0x150   : > { %v529_v21 = vsub.s32 0, %v528_v20  ;;  %v537_v23 = vsub.s32 2, %v528_v20  ;;  %v533_v24 = vsub.s32 1, %v528_v20  ;;  %v541_v25 = vsub.s32 3, %v528_v20 }
 0x151   : > { %v545_v56 = vsub.s32 4, %v528_v20  ;;  %v553_v48 = vsub.s32 6, %v528_v20  ;;  %v549_v49 = vsub.s32 5, %v528_v20 }
 0x152   : > { %2099 = vmatpush1.bf16.msra.mxu0 %v2615_v28  ;;  %2185 = vmatpush1.bf16.msra.mxu1 %v2617_v29  ;;  %v530_v26 = vrot.slane %v525_v22, %v529_v21  ;;  %v538_v27 = vrot.slane %v525_v22, %v537_v23  ;;  %v534_v28 = vrot.slane %v525_v22, %v533_v24 }
 0x153   : > { %2100 = vmatprep.subr.bf16.mxu0 %v2624_v30  ;;  %2186 = vmatprep.subr.bf16.mxu1 %v2626_v31  ;;  %v542_v29 = vrot.slane %v525_v22, %v541_v25 }
 0x156   : > { %2101 = vmatpush1.bf16.msra.mxu0 %v2623_v36  ;;  %2187 = vmatpush1.bf16.msra.mxu1 %v2625_v37 }
 0x157   : > { %2102 = vmatprep.subr.bf16.mxu0 %v2632_v38  ;;  %2188 = vmatprep.subr.bf16.mxu1 %v2634_v39 }
 0x15a   : > { %2103 = vmatpush1.bf16.msra.mxu0 %v2631_v10  ;;  %2189 = vmatpush1.bf16.msra.mxu1 %v2633_v44 }
 0x15b   : > { %2104 = vmatprep.subr.bf16.mxu0 %v2640_v45  ;;  %2190 = vmatprep.subr.bf16.mxu1 %v2642_v46 }
 0x15e   : > { %2105 = vmatpush1.bf16.msra.mxu0 %v2639_v50  ;;  %2191 = vmatpush1.bf16.msra.mxu1 %v2641_v51  ;;  %v557_v50 = vsub.s32 7, %v528_v20  ;;  %v546_v51 = vrot.slane %v525_v22, %v545_v56 }
 0x15f   : > { %2106 = vmatprep.subr.bf16.mxu0 %v2648_v19  ;;  %2192 = vmatprep.subr.bf16.mxu1 %v2650_v52  ;;  %v554_v19 = vrot.slane %v525_v22, %v553_v48  ;;  %v550_v52 = vrot.slane %v525_v22, %v549_v49 }
 0x160   : > { %v558_v53 = vrot.slane %v525_v22, %v557_v50 }
 0x162   : > { %2107 = vmatpush1.bf16.msra.mxu0 %v2647_v58  ;;  %2193 = vmatpush1.bf16.msra.mxu1 %v2649_v59 }
 0x163   : > { %2108 = vmatprep.subr.bf16.mxu0 %v2656_v60  ;;  %2194 = vmatprep.subr.bf16.mxu1 %v2658_v61 }
 0x166   : > { %2109 = vmatpush1.bf16.msra.mxu0 %v2655_v2  ;;  %2195 = vmatpush1.bf16.msra.mxu1 %v2657_v3 }
 0x167   : > { %2110 = vmatprep.subr.bf16.mxu0 %v2664_v4  ;;  %2196 = vmatprep.subr.bf16.mxu1 %v2666_v5 }
 0x16a   : > { %2111 = vmatpush1.bf16.msra.mxu0 %v2663_v11  ;;  %2197 = vmatpush1.bf16.msra.mxu1 %v2665_v12 }
 0x16b   : > { %2112 = vmatprep.subr.bf16.mxu0 %v2672_v13  ;;  %2198 = vmatprep.subr.bf16.mxu1 %v2674_v14 }
 0x16e   : > { %2113 = vmatpush1.bf16.msra.mxu0 %v2671_v15  ;;  %2199 = vmatpush1.bf16.msra.mxu1 %v2673_v16 }
 0x171   : > { %2115 = vmatmul.mubr.bf16.vlgmr.msra.gmra.mrb[4].mxu0 %v3247_v17  ;;  %2201 = vmatmul.mubr.bf16.vlgmr.msra.gmra.mrb[4].mxu1 %v3247_v17 }
 0x1c4   : > { %v1944_v30 = vpop.f32.mrb[0].mxu0  ;;  %v2030_v32 = vpop.f32.mrb[0].mxu1 }
 0x1c5   : > { %v2698_v31 = vadd.f32 %v1944_v30, %v530_v26  ;;  %v1946_v33 = vpop.f32.mrb[1].mxu0  ;;  %v2702_v34 = vadd.f32 %v2030_v32, %v538_v27  ;;  %v2032_v36 = vpop.f32.mrb[1].mxu1 }
 0x1c6   : > { %v2699_v35 = vadd.f32 %v1946_v33, %v534_v28  ;;  %v1948_v17 = vpop.f32.mrb[2].mxu0  ;;  %v2703_v37 = vadd.f32 %v2032_v36, %v542_v29  ;;  %v2034_v39 = vpop.f32.mrb[2].mxu1 }
 0x1c7   : > { %v2700_v38 = vadd.f32 %v1948_v17, %v530_v26  ;;  %v1950_v40 = vpop.f32.mrb[3].mxu0  ;;  %v2704_v42 = vadd.f32 %v2034_v39, %v538_v27  ;;  %v2036_v10 = vpop.f32.mrb[3].mxu1 }
 0x1c8   : > { %v2689_v41 = vpack.c.bf16 %v2699_v35, %v2698_v31  ;;  %v2701_v43 = vadd.f32 %v1950_v40, %v534_v28  ;;  %v2690_v44 = vpack.c.bf16 %v2703_v37, %v2702_v34  ;;  %v2705_v45 = vadd.f32 %v2036_v10, %v542_v29 }
 0x1ca   : > { %2259 = vst [vmem:[%s3260_s22] sm:$0xff] %v2689_v41  ;;  %v2693_v46 = vpack.c.bf16 %v2701_v43, %v2700_v38  ;;  %2260 = vst [vmem:[%s3260_s22 + $0x8] sm:$0xff] %v2690_v44  ;;  %v2694_v47 = vpack.c.bf16 %v2705_v45, %v2704_v42 }
 0x1cc   : > { %2263 = vst [vmem:[%s3260_s22 + $0x20] sm:$0xff] %v2693_v46  ;;  %2264 = vst [vmem:[%s3260_s22 + $0x28] sm:$0xff] %v2694_v47 }
 0x244   : > { %v2116_v54 = vpop.f32.mrb[4].mxu0  ;;  %v2202_v57 = vpop.f32.mrb[4].mxu1 }
 0x245   : > { %v2706_v55 = vadd.f32 %v2116_v54, %v546_v51  ;;  %v2118_v58 = vpop.f32.mrb[5].mxu0  ;;  %v2710_v59 = vadd.f32 %v2202_v57, %v554_v19  ;;  %v2204_v61 = vpop.f32.mrb[5].mxu1 }
 0x246   : > { %v2707_v60 = vadd.f32 %v2118_v58, %v550_v52  ;;  %v2120_v62 = vpop.f32.mrb[6].mxu0  ;;  %v2711_v63 = vadd.f32 %v2204_v61, %v558_v53  ;;  %v2206_v1 = vpop.f32.mrb[6].mxu1 }
 0x247   : > { %v2708_v0 = vadd.f32 %v2120_v62, %v546_v51  ;;  %v2122_v2 = vpop.f32.mrb[7].mxu0  ;;  %v2712_v4 = vadd.f32 %v2206_v1, %v554_v19  ;;  %v2208_v6 = vpop.f32.mrb[7].mxu1 }
 0x248   : > { %v2691_v3 = vpack.c.bf16 %v2707_v60, %v2706_v55  ;;  %v2709_v5 = vadd.f32 %v2122_v2, %v550_v52  ;;  %v2692_v7 = vpack.c.bf16 %v2711_v63, %v2710_v59  ;;  %v2713_v8 = vadd.f32 %v2208_v6, %v558_v53 }
 0x24a   : > { %2261 = vst [vmem:[%s3260_s22 + $0x10] sm:$0xff] %v2691_v3  ;;  %v2695_v9 = vpack.c.bf16 %v2709_v5, %v2708_v0  ;;  %2262 = vst [vmem:[%s3260_s22 + $0x18] sm:$0xff] %v2692_v7  ;;  %v2696_v11 = vpack.c.bf16 %v2713_v8, %v2712_v4 }
 0x24c   : > { %2265 = vst [vmem:[%s3260_s22 + $0x30] sm:$0xff] %v2695_v9  ;;  %2266 = vst [vmem:[%s3260_s22 + $0x38] sm:$0xff] %v2696_v11 }
 0x24d   : > { %2924 = shalt.err (!%p2921_p11)
}
 0x24e   : > { %s2925_s9 = scalar_lea.hbm %s3274_s26, 1024  ;;  %s2929_s29 = scalar_lea.hbm %s3329_s3, 2048 }
 0x24f   : > { %p2926_p0 = scmp.ne.s32.totalorder %s3274_s26, %s2925_s9  ;;  %p2930_p6 = scmp.lt.u32.totalorder %s3274_s26, %s3329_s3 }
 0x250   : > { %p2931_p7 = scmp.lt.u32.totalorder %s2929_s29, %s2925_s9  ;;  %p2933_p8 = scmp.lt.u32.totalorder %s2925_s9, %s3274_s26 }
 0x251   : > { %p2927_p4 = pnand %p2926_p0, %p3344_p12 }
 0x252   : > { %p2932_p2 = por %p2931_p7, %p2930_p6 }
 0x253   : > { %p2928_p13 = pneg %p2927_p4 }
 0x254   : > { %p2934_p1 = por %p2933_p8, %p2932_p2 }
 0x256   : > { %p2935_p10 = pnand %p2934_p1, %p2928_p13 }
 0x258   : > { %2938 = shalt.err (!%p2935_p10)
}
 0x259   : > { %s3007_s22 = smov 512   ;;  %s3008_s6 = smov 32  }
 0x25a   : > { %2740 = dma.vmem_to_hbm [thread:$0]  (%p3344_p12), %s3268_s24, 1024, %s3274_s26, %s2268_s15, %s3007_s22, %s3007_s22, %s3008_s6  }
 0x25b PF: > { %s2301_s7 = sand.u32 1, %s2977_s12   ;;  %p3345_p3 = scmp.ne.s32.totalorder %s3337_s23, 0 }
 0x25c   : > { %p3346_p5 = scmp.ge.s32.totalorder %s2997_s17, 2  ;;  %s2302_s8 = scalar_lea.sflag [#allocation4], %s2301_s7 }
 0x25e   : > { %p2754_p9 = pnand %p3346_p5, %p3345_p3 }
 0x260   : > { %2972 = dma.done.wait (!%p2754_p9), %s2302_s8, 1024  }
 0x261   : > { %2974 = vsyncadd (!%p2754_p9), %s2302_s8, 4294966272  ;;  %s20_s17 = sadd.s32 1, %s2997_s17   ;;  %s3347_s12 = smov %s2981_s13 }
 0x262   : > { %p17_p11 = scmp.ge.s32.totalorder %s20_s17, 4   ;;  %s3348_s13 = smov %s2985_s14 }
 0x263   : > { %s3349_s14 = smov %s3171_s30  ;;  %s3350_s15 = smov %s2993_s16 }
 0x264   : > { %s3351_s16 = smov %s3353_s11  ;;  %19 = sbr.rel (!%p17_p11) target bundleno = 7 (0x7), region = 87 }
 0x26b   :  { %2307 = vsyncpa [#allocation3], 1 }
 0x26c   :  { %2309 = vsyncpa [#allocation3 + $0x1], 1 }
 0x26d   :  { %2310 = vsyncpa [#allocation6], 1 }
 0x26e   :  { %2311 = vsyncpa [#allocation4], 1 }
 0x26f   :  { %2313 = vsyncpa [#allocation4 + $0x1], 1 }

</bundles_post_ra>
